<compile_context>
chip_gen: v6e
topology: v6e:2x2x1
jax: 0.10.0
libtpu: 0.0.40
codegen_flags: <defaults>
</compile_context>

<pallas_src>
import functools

import jax
import jax.numpy as jnp
from jax.experimental import pallas as pl
from jax.experimental.pallas import tpu as pltpu


# ------------------------------ tiled matmul kernel ------------------------------

def _round_up(x, m):
    return ((x + m - 1) // m) * m


def _pick_tile(dim, want, align=128):
    """Largest multiple of `align` that divides round_up(dim, align) and is <= want."""
    padded = _round_up(max(int(dim), 1), align)
    q = padded // align
    best = 1
    for t in range(1, q + 1):
        if q % t == 0 and t * align <= want:
            best = t
    return best * align, padded


def _matmul_kernel(a_ref, b_ref, bias_ref, o_ref, acc_ref, *, relu):
    """o = [relu](a @ b + bias); f32 accumulation over the K grid axis."""
    k = pl.program_id(2)

    @pl.when(k == 0)
    def _():
        acc_ref[...] = jnp.zeros_like(acc_ref)

    acc_ref[...] += jnp.dot(a_ref[...], b_ref[...],
                            preferred_element_type=jnp.float32)

    @pl.when(k == pl.num_programs(2) - 1)
    def _():
        out = acc_ref[...] + bias_ref[...]          # bias is (1, tn), zeros if unused
        if relu:
            out = jnp.maximum(out, 0.0)
        o_ref[...] = out.astype(o_ref.dtype)


def pallas_matmul(a, b, bias=None, *, relu=False, out_dtype=jnp.float32,
                  tm_want=512, tn_want=256, tk_want=512):
    """act(a @ b + bias) with bf16 inputs / f32 accumulation, fully tiled + zero-padded."""
    M, K = a.shape
    K2, N = b.shape
    assert K == K2, (a.shape, b.shape)

    tm, Mp = _pick_tile(M, tm_want)
    tn, Np = _pick_tile(N, tn_want)
    tk, Kp = _pick_tile(K, tk_want)

    a_p = jnp.pad(a.astype(jnp.bfloat16), ((0, Mp - M), (0, Kp - K)))
    b_p = jnp.pad(b.astype(jnp.bfloat16), ((0, Kp - K), (0, Np - N)))
    if bias is None:
        bias_p = jnp.zeros((1, Np), jnp.float32)
    else:
        bias_p = jnp.pad(bias.reshape(1, -1).astype(jnp.float32), ((0, 0), (0, Np - N)))

    grid = (Mp // tm, Np // tn, Kp // tk)
    out_itemsize = jnp.dtype(out_dtype).itemsize
    cost = pl.CostEstimate(
        flops=2 * Mp * Np * Kp,
        transcendentals=0,
        bytes_accessed=Mp * Kp * 2 + Kp * Np * 2 + Np * 4 + Mp * Np * out_itemsize,
    )

    out_p = pl.pallas_call(
        functools.partial(_matmul_kernel, relu=relu),
        out_shape=jax.ShapeDtypeStruct((Mp, Np), out_dtype),
        grid_spec=pltpu.PrefetchScalarGridSpec(
            num_scalar_prefetch=0,
            grid=grid,
            in_specs=[
                pl.BlockSpec((tm, tk), lambda i, j, k: (i, k)),
                pl.BlockSpec((tk, tn), lambda i, j, k: (k, j)),
                pl.BlockSpec((1, tn), lambda i, j, k: (0, j)),
            ],
            out_specs=pl.BlockSpec((tm, tn), lambda i, j, k: (i, j)),
            scratch_shapes=[pltpu.VMEM((tm, tn), jnp.float32)],
        ),
        compiler_params=pltpu.CompilerParams(
            dimension_semantics=("parallel", "parallel", "arbitrary"),
            vmem_limit_bytes=32 * 1024 * 1024,
        ),
        cost_estimate=cost,
    )(a_p, b_p, bias_p)

    return out_p[:M, :N]


# ------------------------------ GCN forward ------------------------------

def gcn_forward(A_hat, X, W1, W2, b2):
    """A_hat: (n,n), X: (n,d), W1: (n_hidden,d), W2: (n_classes,n_hidden), b2: (n_classes,)."""
    # layer 1: SparseGCNConv(n_features -> n_hidden), no bias, then ReLU
    z1 = pallas_matmul(X, W1.T, out_dtype=jnp.bfloat16)                  # X @ W1^T
    h1 = pallas_matmul(A_hat, z1, relu=True, out_dtype=jnp.bfloat16)     # relu(A_hat @ Z1)
    # TODO(synk): F.dropout(p=0.5, training=True) is stochastic; implemented as eval-mode identity.
    # layer 2: GCNConv(n_hidden -> n_classes), bias added after propagate
    z2 = pallas_matmul(h1, W2.T, out_dtype=jnp.bfloat16)                 # H1 @ W2^T
    out = pallas_matmul(A_hat, z2, bias=b2, out_dtype=jnp.float32)       # A_hat @ Z2 + b2
    return out


# ------------------------- JAX glue (sparse -> dense setup) -------------------------

def densify_attr(attr_idx, n, d):
    """spmm(attr_idx, ones, n, d, W) == (dense COO with values 1, duplicates summed) @ W."""
    return jnp.zeros((n, d), jnp.float32).at[attr_idx[0], attr_idx[1]].add(1.0)


def gcn_norm_dense(edge_idx, n):
    """Dense A_hat = D^-1/2 (A + I) D^-1/2 with PyG gcn_norm conventions
    (edge_weight = 1, self-loops added, deg computed over target/col index)."""
    row, col = edge_idx[0], edge_idx[1]
    loop = jnp.arange(n, dtype=row.dtype)
    row = jnp.concatenate([row, loop])
    col = jnp.concatenate([col, loop])
    ew = jnp.ones(row.shape, jnp.float32)
    deg = jnp.zeros((n,), jnp.float32).at[col].add(ew)
    dinv = jnp.where(deg > 0.0, jax.lax.rsqrt(deg), 0.0)
    norm = dinv[row] * ew * dinv[col]
    # propagate (source_to_target): out[i] = sum over edges (j=row -> i=col) of norm * x[j]
    return jnp.zeros((n, n), jnp.float32).at[col, row].add(norm)


def gcn_reference(A_hat, X, W1, W2, b2):
    h1 = jnp.maximum(A_hat @ (X @ W1.T), 0.0)
    return A_hat @ (h1 @ W2.T) + b2[None, :]


if __name__ == "__main__":
    key = jax.random.PRNGKey(0)
    n, d, n_hidden, n_classes = 256, 160, 64, 10
    k1, k2, k3, k4, k5, k6, k7 = jax.random.split(key, 7)

    # sparse binary node attributes (COO indices), ~4 nonzeros per node
    nnz_attr = 4 * n
    attr_idx = jnp.stack([
        jax.random.randint(k1, (nnz_attr,), 0, n),
        jax.random.randint(k2, (nnz_attr,), 0, d),
    ])                                                    # (2, nnz_attr) int32

    # random directed edges
    n_edges = 4 * n
    edge_idx = jnp.stack([
        jax.random.randint(k3, (n_edges,), 0, n),
        jax.random.randint(k4, (n_edges,), 0, n),
    ])                                                    # (2, n_edges) int32

    # deterministic glorot-uniform parameters (PyG GCNConv: lin.weight (out,in), bias (out,))
    def glorot(k, shape):
        lim = (6.0 / (shape[0] + shape[1])) ** 0.5
        return jax.random.uniform(k, shape, jnp.float32, -lim, lim)

    W1 = glorot(k5, (n_hidden, d))          # conv1.lin.weight  (SparseGCNConv: no bias used)
    W2 = glorot(k6, (n_classes, n_hidden))  # conv2.lin.weight
    b2 = 0.01 * jax.random.normal(k7, (n_classes,), jnp.float32)  # conv2.bias

    X = densify_attr(attr_idx, n, d)        # (n, d)
    A_hat = gcn_norm_dense(edge_idx, n)     # (n, n)

    logits = jax.jit(gcn_forward)(A_hat, X, W1, W2, b2)
    jax.block_until_ready(logits)
    assert logits.shape == (n, n_classes), logits.shape

    ref = gcn_reference(A_hat, X, W1, W2, b2)
    err = float(jnp.max(jnp.abs(logits - ref)))
    assert err < 5e-2, f"max abs error vs f32 reference too large: {err}"

    print("KERNEL_OK")
</pallas_src>

<mosaic_0001>
module attributes {stable_mosaic.version = 11 : i64} {
  func.func @_matmul_kernel(%arg0: i32, %arg1: i32, %arg2: i32, %arg3: memref<256x256xbf16, #tpu.memory_space<vmem>>, %arg4: memref<256x128xbf16, #tpu.memory_space<vmem>>, %arg5: memref<1x128xf32, #tpu.memory_space<vmem>>, %arg6: memref<256x128xbf16, #tpu.memory_space<vmem>>, %arg7: memref<256x128xf32, #tpu.memory_space<vmem>>) attributes {dimension_semantics = [#tpu.dimension_semantics<parallel>, #tpu.dimension_semantics<parallel>, #tpu.dimension_semantics<arbitrary>], iteration_bounds = array<i64: 1, 1, 1>, scalar_prefetch = 0 : i64, scratch_operands = 1 : i64, tpu.core_type = #tpu.core_type<tc>, window_params = [{transform_indices = @transform_0, window_bounds = array<i64: 256, 256>}, {transform_indices = @transform_1, window_bounds = array<i64: 256, 128>}, {transform_indices = @transform_2, window_bounds = array<i64: 1, 128>}, {transform_indices = @transform_3, window_bounds = array<i64: 256, 128>}]} {
    %c0_i32 = arith.constant 0 : i32
    %0 = arith.cmpi eq, %arg2, %c0_i32 : i32
    %1 = arith.extui %0 : i1 to i32
    %c0_i32_0 = arith.constant 0 : i32
    %2 = arith.cmpi ne, %1, %c0_i32_0 : i32
    scf.if %2 {
      %cst_10 = arith.constant 0.000000e+00 : f32
      %12 = vector.broadcast %cst_10 : f32 to vector<256x128xf32>
      %c0_11 = arith.constant 0 : index
      %c0_12 = arith.constant 0 : index
      %13 = vector.load %arg7[%c0_11, %c0_12] : memref<256x128xf32, #tpu.memory_space<vmem>>, vector<256x128xf32>
      tpu.vector_store %arg7[%c0_11, %c0_12], %12 {strides = array<i32>} : memref<256x128xf32, #tpu.memory_space<vmem>>, vector<256x128xf32>,
    } else {
    }
    %c0 = arith.constant 0 : index
    %c0_1 = arith.constant 0 : index
    %3 = vector.load %arg7[%c0, %c0_1] : memref<256x128xf32, #tpu.memory_space<vmem>>, vector<256x128xf32>
    %c0_2 = arith.constant 0 : index
    %c0_3 = arith.constant 0 : index
    %4 = vector.load %arg3[%c0_2, %c0_3] : memref<256x256xbf16, #tpu.memory_space<vmem>>, vector<256x256xbf16>
    %c0_4 = arith.constant 0 : index
    %c0_5 = arith.constant 0 : index
    %5 = vector.load %arg4[%c0_4, %c0_5] : memref<256x128xbf16, #tpu.memory_space<vmem>>, vector<256x128xbf16>
    %cst = arith.constant dense<0.000000e+00> : vector<256x128xf32>
    %6 = tpu.matmul %4, %5, %cst {dimension_numbers = #tpu.dot_dimension_numbers<[1], [0], [0], [1], [0, 0, 1, 1], [], []>} : vector<256x256xbf16>, vector<256x128xbf16>, vector<256x128xf32> -> vector<256x128xf32>
    %7 = arith.addf %3, %6 : vector<256x128xf32>
    %c0_6 = arith.constant 0 : index
    %c0_7 = arith.constant 0 : index
    %8 = vector.load %arg7[%c0_6, %c0_7] : memref<256x128xf32, #tpu.memory_space<vmem>>, vector<256x128xf32>
    tpu.vector_store %arg7[%c0_6, %c0_7], %7 {strides = array<i32>} : memref<256x128xf32, #tpu.memory_space<vmem>>, vector<256x128xf32>,
    %c0_i32_8 = arith.constant 0 : i32
    %9 = arith.cmpi eq, %arg2, %c0_i32_8 : i32
    %10 = arith.extui %9 : i1 to i32
    %c0_i32_9 = arith.constant 0 : i32
    %11 = arith.cmpi ne, %10, %c0_i32_9 : i32
    scf.if %11 {
      %c0_10 = arith.constant 0 : index
      %c0_11 = arith.constant 0 : index
      %12 = vector.load %arg7[%c0_10, %c0_11] : memref<256x128xf32, #tpu.memory_space<vmem>>, vector<256x128xf32>
      %c0_12 = arith.constant 0 : index
      %c0_13 = arith.constant 0 : index
      %13 = vector.load %arg5[%c0_12, %c0_13] : memref<1x128xf32, #tpu.memory_space<vmem>>, vector<1x128xf32>
      %14 = vector.broadcast %13 : vector<1x128xf32> to vector<256x128xf32>
      %15 = arith.addf %12, %14 : vector<256x128xf32>
      %16 = arith.truncf %15 : vector<256x128xf32> to vector<256x128xbf16>
      %c0_14 = arith.constant 0 : index
      %c0_15 = arith.constant 0 : index
      %17 = vector.load %arg6[%c0_14, %c0_15] : memref<256x128xbf16, #tpu.memory_space<vmem>>, vector<256x128xbf16>
      tpu.vector_store %arg6[%c0_14, %c0_15], %16 {strides = array<i32>} : memref<256x128xbf16, #tpu.memory_space<vmem>>, vector<256x128xbf16>,
    } else {
    }
    return
  }
  func.func @transform_0(%arg0: i32, %arg1: i32, %arg2: i32) -> (i32, i32) {
    %c0_i32 = arith.constant 0 : i32
    return %arg0, %arg2 : i32, i32
  }
  func.func @transform_1(%arg0: i32, %arg1: i32, %arg2: i32) -> (i32, i32) {
    %c0_i32 = arith.constant 0 : i32
    return %arg2, %arg1 : i32, i32
  }
  func.func @transform_2(%arg0: i32, %arg1: i32, %arg2: i32) -> (i32, i32) {
    %c0_i32 = arith.constant 0 : i32
    %c0_i32_0 = arith.constant 0 : i32
    return %c0_i32, %arg1 : i32, i32
  }
  func.func @transform_3(%arg0: i32, %arg1: i32, %arg2: i32) -> (i32, i32) {
    %c0_i32 = arith.constant 0 : i32
    return %arg0, %arg1 : i32, i32
  }
}

module attributes {stable_mosaic.version = 11 : i64} {
  func.func @_matmul_kernel(%arg0: i32, %arg1: i32, %arg2: i32, %arg3: memref<256x256xbf16, #tpu.memory_space<vmem>>, %arg4: memref<256x128xbf16, #tpu.memory_space<vmem>>, %arg5: memref<1x128xf32, #tpu.memory_space<vmem>>, %arg6: memref<256x128xbf16, #tpu.memory_space<vmem>>, %arg7: memref<256x128xf32, #tpu.memory_space<vmem>>) attributes {dimension_semantics = [#tpu.dimension_semantics<parallel>, #tpu.dimension_semantics<parallel>, #tpu.dimension_semantics<arbitrary>], iteration_bounds = array<i64: 1, 1, 1>, scalar_prefetch = 0 : i64, scratch_operands = 1 : i64, tpu.core_type = #tpu.core_type<tc>, window_params = [{transform_indices = @transform_0, window_bounds = array<i64: 256, 256>}, {transform_indices = @transform_1, window_bounds = array<i64: 256, 128>}, {transform_indices = @transform_2, window_bounds = array<i64: 1, 128>}, {transform_indices = @transform_3, window_bounds = array<i64: 256, 128>}]} {
    %c0_i32 = arith.constant 0 : i32
    %0 = arith.cmpi eq, %arg2, %c0_i32 : i32
    %1 = arith.extui %0 : i1 to i32
    %c0_i32_0 = arith.constant 0 : i32
    %2 = arith.cmpi ne, %1, %c0_i32_0 : i32
    scf.if %2 {
      %cst_10 = arith.constant 0.000000e+00 : f32
      %12 = vector.broadcast %cst_10 : f32 to vector<256x128xf32>
      %c0_11 = arith.constant 0 : index
      %c0_12 = arith.constant 0 : index
      %13 = vector.load %arg7[%c0_11, %c0_12] : memref<256x128xf32, #tpu.memory_space<vmem>>, vector<256x128xf32>
      tpu.vector_store %arg7[%c0_11, %c0_12], %12 {strides = array<i32>} : memref<256x128xf32, #tpu.memory_space<vmem>>, vector<256x128xf32>,
    } else {
    }
    %c0 = arith.constant 0 : index
    %c0_1 = arith.constant 0 : index
    %3 = vector.load %arg7[%c0, %c0_1] : memref<256x128xf32, #tpu.memory_space<vmem>>, vector<256x128xf32>
    %c0_2 = arith.constant 0 : index
    %c0_3 = arith.constant 0 : index
    %4 = vector.load %arg3[%c0_2, %c0_3] : memref<256x256xbf16, #tpu.memory_space<vmem>>, vector<256x256xbf16>
    %c0_4 = arith.constant 0 : index
    %c0_5 = arith.constant 0 : index
    %5 = vector.load %arg4[%c0_4, %c0_5] : memref<256x128xbf16, #tpu.memory_space<vmem>>, vector<256x128xbf16>
    %cst = arith.constant dense<0.000000e+00> : vector<256x128xf32>
    %6 = tpu.matmul %4, %5, %cst {dimension_numbers = #tpu.dot_dimension_numbers<[1], [0], [0], [1], [0, 0, 1, 1], [], []>} : vector<256x256xbf16>, vector<256x128xbf16>, vector<256x128xf32> -> vector<256x128xf32>
    %7 = arith.addf %3, %6 : vector<256x128xf32>
    %c0_6 = arith.constant 0 : index
    %c0_7 = arith.constant 0 : index
    %8 = vector.load %arg7[%c0_6, %c0_7] : memref<256x128xf32, #tpu.memory_space<vmem>>, vector<256x128xf32>
    tpu.vector_store %arg7[%c0_6, %c0_7], %7 {strides = array<i32>} : memref<256x128xf32, #tpu.memory_space<vmem>>, vector<256x128xf32>,
    %c0_i32_8 = arith.constant 0 : i32
    %9 = arith.cmpi eq, %arg2, %c0_i32_8 : i32
    %10 = arith.extui %9 : i1 to i32
    %c0_i32_9 = arith.constant 0 : i32
    %11 = arith.cmpi ne, %10, %c0_i32_9 : i32
    scf.if %11 {
      %c0_10 = arith.constant 0 : index
      %c0_11 = arith.constant 0 : index
      %12 = vector.load %arg7[%c0_10, %c0_11] : memref<256x128xf32, #tpu.memory_space<vmem>>, vector<256x128xf32>
      %c0_12 = arith.constant 0 : index
      %c0_13 = arith.constant 0 : index
      %13 = vector.load %arg5[%c0_12, %c0_13] : memref<1x128xf32, #tpu.memory_space<vmem>>, vector<1x128xf32>
      %14 = vector.broadcast %13 : vector<1x128xf32> to vector<256x128xf32>
      %15 = arith.addf %12, %14 : vector<256x128xf32>
      %cst_14 = arith.constant 0.000000e+00 : f32
      %16 = vector.broadcast %cst_14 : f32 to vector<256x128xf32>
      %17 = arith.maximumf %15, %16 : vector<256x128xf32>
      %18 = arith.truncf %17 : vector<256x128xf32> to vector<256x128xbf16>
      %c0_15 = arith.constant 0 : index
      %c0_16 = arith.constant 0 : index
      %19 = vector.load %arg6[%c0_15, %c0_16] : memref<256x128xbf16, #tpu.memory_space<vmem>>, vector<256x128xbf16>
      tpu.vector_store %arg6[%c0_15, %c0_16], %18 {strides = array<i32>} : memref<256x128xbf16, #tpu.memory_space<vmem>>, vector<256x128xbf16>,
    } else {
    }
    return
  }
  func.func @transform_0(%arg0: i32, %arg1: i32, %arg2: i32) -> (i32, i32) {
    %c0_i32 = arith.constant 0 : i32
    return %arg0, %arg2 : i32, i32
  }
  func.func @transform_1(%arg0: i32, %arg1: i32, %arg2: i32) -> (i32, i32) {
    %c0_i32 = arith.constant 0 : i32
    return %arg2, %arg1 : i32, i32
  }
  func.func @transform_2(%arg0: i32, %arg1: i32, %arg2: i32) -> (i32, i32) {
    %c0_i32 = arith.constant 0 : i32
    %c0_i32_0 = arith.constant 0 : i32
    return %c0_i32, %arg1 : i32, i32
  }
  func.func @transform_3(%arg0: i32, %arg1: i32, %arg2: i32) -> (i32, i32) {
    %c0_i32 = arith.constant 0 : i32
    return %arg0, %arg1 : i32, i32
  }
}

module attributes {stable_mosaic.version = 11 : i64} {
  func.func @_matmul_kernel(%arg0: i32, %arg1: i32, %arg2: i32, %arg3: memref<256x128xbf16, #tpu.memory_space<vmem>>, %arg4: memref<128x128xbf16, #tpu.memory_space<vmem>>, %arg5: memref<1x128xf32, #tpu.memory_space<vmem>>, %arg6: memref<256x128xbf16, #tpu.memory_space<vmem>>, %arg7: memref<256x128xf32, #tpu.memory_space<vmem>>) attributes {dimension_semantics = [#tpu.dimension_semantics<parallel>, #tpu.dimension_semantics<parallel>, #tpu.dimension_semantics<arbitrary>], iteration_bounds = array<i64: 1, 1, 1>, scalar_prefetch = 0 : i64, scratch_operands = 1 : i64, tpu.core_type = #tpu.core_type<tc>, window_params = [{transform_indices = @transform_0, window_bounds = array<i64: 256, 128>}, {transform_indices = @transform_1, window_bounds = array<i64: 128, 128>}, {transform_indices = @transform_2, window_bounds = array<i64: 1, 128>}, {transform_indices = @transform_3, window_bounds = array<i64: 256, 128>}]} {
    %c0_i32 = arith.constant 0 : i32
    %0 = arith.cmpi eq, %arg2, %c0_i32 : i32
    %1 = arith.extui %0 : i1 to i32
    %c0_i32_0 = arith.constant 0 : i32
    %2 = arith.cmpi ne, %1, %c0_i32_0 : i32
    scf.if %2 {
      %cst_10 = arith.constant 0.000000e+00 : f32
      %12 = vector.broadcast %cst_10 : f32 to vector<256x128xf32>
      %c0_11 = arith.constant 0 : index
      %c0_12 = arith.constant 0 : index
      %13 = vector.load %arg7[%c0_11, %c0_12] : memref<256x128xf32, #tpu.memory_space<vmem>>, vector<256x128xf32>
      tpu.vector_store %arg7[%c0_11, %c0_12], %12 {strides = array<i32>} : memref<256x128xf32, #tpu.memory_space<vmem>>, vector<256x128xf32>,
    } else {
    }
    %c0 = arith.constant 0 : index
    %c0_1 = arith.constant 0 : index
    %3 = vector.load %arg7[%c0, %c0_1] : memref<256x128xf32, #tpu.memory_space<vmem>>, vector<256x128xf32>
    %c0_2 = arith.constant 0 : index
    %c0_3 = arith.constant 0 : index
    %4 = vector.load %arg3[%c0_2, %c0_3] : memref<256x128xbf16, #tpu.memory_space<vmem>>, vector<256x128xbf16>
    %c0_4 = arith.constant 0 : index
    %c0_5 = arith.constant 0 : index
    %5 = vector.load %arg4[%c0_4, %c0_5] : memref<128x128xbf16, #tpu.memory_space<vmem>>, vector<128x128xbf16>
    %cst = arith.constant dense<0.000000e+00> : vector<256x128xf32>
    %6 = tpu.matmul %4, %5, %cst {dimension_numbers = #tpu.dot_dimension_numbers<[1], [0], [0], [1], [0, 0, 1, 1], [], []>} : vector<256x128xbf16>, vector<128x128xbf16>, vector<256x128xf32> -> vector<256x128xf32>
    %7 = arith.addf %3, %6 : vector<256x128xf32>
    %c0_6 = arith.constant 0 : index
    %c0_7 = arith.constant 0 : index
    %8 = vector.load %arg7[%c0_6, %c0_7] : memref<256x128xf32, #tpu.memory_space<vmem>>, vector<256x128xf32>
    tpu.vector_store %arg7[%c0_6, %c0_7], %7 {strides = array<i32>} : memref<256x128xf32, #tpu.memory_space<vmem>>, vector<256x128xf32>,
    %c0_i32_8 = arith.constant 0 : i32
    %9 = arith.cmpi eq, %arg2, %c0_i32_8 : i32
    %10 = arith.extui %9 : i1 to i32
    %c0_i32_9 = arith.constant 0 : i32
    %11 = arith.cmpi ne, %10, %c0_i32_9 : i32
    scf.if %11 {
      %c0_10 = arith.constant 0 : index
      %c0_11 = arith.constant 0 : index
      %12 = vector.load %arg7[%c0_10, %c0_11] : memref<256x128xf32, #tpu.memory_space<vmem>>, vector<256x128xf32>
      %c0_12 = arith.constant 0 : index
      %c0_13 = arith.constant 0 : index
      %13 = vector.load %arg5[%c0_12, %c0_13] : memref<1x128xf32, #tpu.memory_space<vmem>>, vector<1x128xf32>
      %14 = vector.broadcast %13 : vector<1x128xf32> to vector<256x128xf32>
      %15 = arith.addf %12, %14 : vector<256x128xf32>
      %16 = arith.truncf %15 : vector<256x128xf32> to vector<256x128xbf16>
      %c0_14 = arith.constant 0 : index
      %c0_15 = arith.constant 0 : index
      %17 = vector.load %arg6[%c0_14, %c0_15] : memref<256x128xbf16, #tpu.memory_space<vmem>>, vector<256x128xbf16>
      tpu.vector_store %arg6[%c0_14, %c0_15], %16 {strides = array<i32>} : memref<256x128xbf16, #tpu.memory_space<vmem>>, vector<256x128xbf16>,
    } else {
    }
    return
  }
  func.func @transform_0(%arg0: i32, %arg1: i32, %arg2: i32) -> (i32, i32) {
    %c0_i32 = arith.constant 0 : i32
    return %arg0, %arg2 : i32, i32
  }
  func.func @transform_1(%arg0: i32, %arg1: i32, %arg2: i32) -> (i32, i32) {
    %c0_i32 = arith.constant 0 : i32
    return %arg2, %arg1 : i32, i32
  }
  func.func @transform_2(%arg0: i32, %arg1: i32, %arg2: i32) -> (i32, i32) {
    %c0_i32 = arith.constant 0 : i32
    %c0_i32_0 = arith.constant 0 : i32
    return %c0_i32, %arg1 : i32, i32
  }
  func.func @transform_3(%arg0: i32, %arg1: i32, %arg2: i32) -> (i32, i32) {
    %c0_i32 = arith.constant 0 : i32
    return %arg0, %arg1 : i32, i32
  }
}

module attributes {stable_mosaic.version = 11 : i64} {
  func.func @_matmul_kernel(%arg0: i32, %arg1: i32, %arg2: i32, %arg3: memref<256x256xbf16, #tpu.memory_space<vmem>>, %arg4: memref<256x128xbf16, #tpu.memory_space<vmem>>, %arg5: memref<1x128xf32, #tpu.memory_space<vmem>>, %arg6: memref<256x128xf32, #tpu.memory_space<vmem>>, %arg7: memref<256x128xf32, #tpu.memory_space<vmem>>) attributes {dimension_semantics = [#tpu.dimension_semantics<parallel>, #tpu.dimension_semantics<parallel>, #tpu.dimension_semantics<arbitrary>], iteration_bounds = array<i64: 1, 1, 1>, scalar_prefetch = 0 : i64, scratch_operands = 1 : i64, tpu.core_type = #tpu.core_type<tc>, window_params = [{transform_indices = @transform_0, window_bounds = array<i64: 256, 256>}, {transform_indices = @transform_1, window_bounds = array<i64: 256, 128>}, {transform_indices = @transform_2, window_bounds = array<i64: 1, 128>}, {transform_indices = @transform_3, window_bounds = array<i64: 256, 128>}]} {
    %c0_i32 = arith.constant 0 : i32
    %0 = arith.cmpi eq, %arg2, %c0_i32 : i32
    %1 = arith.extui %0 : i1 to i32
    %c0_i32_0 = arith.constant 0 : i32
    %2 = arith.cmpi ne, %1, %c0_i32_0 : i32
    scf.if %2 {
      %cst_10 = arith.constant 0.000000e+00 : f32
      %12 = vector.broadcast %cst_10 : f32 to vector<256x128xf32>
      %c0_11 = arith.constant 0 : index
      %c0_12 = arith.constant 0 : index
      %13 = vector.load %arg7[%c0_11, %c0_12] : memref<256x128xf32, #tpu.memory_space<vmem>>, vector<256x128xf32>
      tpu.vector_store %arg7[%c0_11, %c0_12], %12 {strides = array<i32>} : memref<256x128xf32, #tpu.memory_space<vmem>>, vector<256x128xf32>,
    } else {
    }
    %c0 = arith.constant 0 : index
    %c0_1 = arith.constant 0 : index
    %3 = vector.load %arg7[%c0, %c0_1] : memref<256x128xf32, #tpu.memory_space<vmem>>, vector<256x128xf32>
    %c0_2 = arith.constant 0 : index
    %c0_3 = arith.constant 0 : index
    %4 = vector.load %arg3[%c0_2, %c0_3] : memref<256x256xbf16, #tpu.memory_space<vmem>>, vector<256x256xbf16>
    %c0_4 = arith.constant 0 : index
    %c0_5 = arith.constant 0 : index
    %5 = vector.load %arg4[%c0_4, %c0_5] : memref<256x128xbf16, #tpu.memory_space<vmem>>, vector<256x128xbf16>
    %cst = arith.constant dense<0.000000e+00> : vector<256x128xf32>
    %6 = tpu.matmul %4, %5, %cst {dimension_numbers = #tpu.dot_dimension_numbers<[1], [0], [0], [1], [0, 0, 1, 1], [], []>} : vector<256x256xbf16>, vector<256x128xbf16>, vector<256x128xf32> -> vector<256x128xf32>
    %7 = arith.addf %3, %6 : vector<256x128xf32>
    %c0_6 = arith.constant 0 : index
    %c0_7 = arith.constant 0 : index
    %8 = vector.load %arg7[%c0_6, %c0_7] : memref<256x128xf32, #tpu.memory_space<vmem>>, vector<256x128xf32>
    tpu.vector_store %arg7[%c0_6, %c0_7], %7 {strides = array<i32>} : memref<256x128xf32, #tpu.memory_space<vmem>>, vector<256x128xf32>,
    %c0_i32_8 = arith.constant 0 : i32
    %9 = arith.cmpi eq, %arg2, %c0_i32_8 : i32
    %10 = arith.extui %9 : i1 to i32
    %c0_i32_9 = arith.constant 0 : i32
    %11 = arith.cmpi ne, %10, %c0_i32_9 : i32
    scf.if %11 {
      %c0_10 = arith.constant 0 : index
      %c0_11 = arith.constant 0 : index
      %12 = vector.load %arg7[%c0_10, %c0_11] : memref<256x128xf32, #tpu.memory_space<vmem>>, vector<256x128xf32>
      %c0_12 = arith.constant 0 : index
      %c0_13 = arith.constant 0 : index
      %13 = vector.load %arg5[%c0_12, %c0_13] : memref<1x128xf32, #tpu.memory_space<vmem>>, vector<1x128xf32>
      %14 = vector.broadcast %13 : vector<1x128xf32> to vector<256x128xf32>
      %15 = arith.addf %12, %14 : vector<256x128xf32>
      %c0_14 = arith.constant 0 : index
      %c0_15 = arith.constant 0 : index
      %16 = vector.load %arg6[%c0_14, %c0_15] : memref<256x128xf32, #tpu.memory_space<vmem>>, vector<256x128xf32>
      tpu.vector_store %arg6[%c0_14, %c0_15], %15 {strides = array<i32>} : memref<256x128xf32, #tpu.memory_space<vmem>>, vector<256x128xf32>,
    } else {
    }
    return
  }
  func.func @transform_0(%arg0: i32, %arg1: i32, %arg2: i32) -> (i32, i32) {
    %c0_i32 = arith.constant 0 : i32
    return %arg0, %arg2 : i32, i32
  }
  func.func @transform_1(%arg0: i32, %arg1: i32, %arg2: i32) -> (i32, i32) {
    %c0_i32 = arith.constant 0 : i32
    return %arg2, %arg1 : i32, i32
  }
  func.func @transform_2(%arg0: i32, %arg1: i32, %arg2: i32) -> (i32, i32) {
    %c0_i32 = arith.constant 0 : i32
    %c0_i32_0 = arith.constant 0 : i32
    return %c0_i32, %arg1 : i32, i32
  }
  func.func @transform_3(%arg0: i32, %arg1: i32, %arg2: i32) -> (i32, i32) {
    %c0_i32 = arith.constant 0 : i32
    return %arg0, %arg1 : i32, i32
  }
}

</mosaic_0001>

<bundles_post_ra>
// kernel: gcn_forward.4
= control target key start
LH: loop header
LB: loop body
LE: loop exit
PB: predicated region body
PF: predicated region fallthrough
CT: control target
= control target key end

     0   :  { %s1515_s1 = inlined_call_operand.vmem [shape: bf16[256,128], index: 1, kind: input, shape index: {}]   ;;  %s1516_s0 = inlined_call_operand.vmem [shape: bf16[256,256], index: 0, kind: input, shape index: {}]   ;;  %s1517_s2 = inlined_call_operand.vmem [shape: f32[1,128], index: 2, kind: input, shape index: {}]   ;;  %s1518_s3 = inlined_call_operand.vmem [shape: bf16[256,128], index: 3, kind: output, shape index: {}]  }
   0x1   :  { %v1202_v0 = vld [vmem:[%s1515_s1 + $0x78] sm:$0xff]   ;;  %v1204_v2 = vld [vmem:[%s1515_s1 + $0x70] sm:$0xff]   ;;  %v1206_v4 = vld [vmem:[%s1515_s1 + $0x68] sm:$0xff]  }
   0x2   :  { %v1203_v1 = vld [vmem:[%s1515_s1 + $0x38] sm:$0xff]   ;;  %1074 = vmatprep.subr.bf16.mxu0 %v1202_v0  ;;  %1186 = vmatprep.subr.bf16.mxu1 %v1202_v0  ;;  %v1205_v3 = vld [vmem:[%s1515_s1 + $0x30] sm:$0xff]   ;;  %v1207_v5 = vld [vmem:[%s1515_s1 + $0x28] sm:$0xff]  }
   0x3   :  { %1075 = vmatpush3.bf16.msra.mxu0 %v1203_v1  ;;  %1194 = vmatpush3.bf16.msra.mxu1 %v1203_v1  ;;  %v1208_v6 = vld [vmem:[%s1515_s1 + $0x60] sm:$0xff]   ;;  %v1210_v8 = vld [vmem:[%s1515_s1 + $0x58] sm:$0xff]   ;;  %v1212_v10 = vld [vmem:[%s1515_s1 + $0x50] sm:$0xff]  }
   0x4   :  { %1076 = vmatprep.subr.bf16.mxu0 %v1204_v2  ;;  %1187 = vmatprep.subr.bf16.mxu1 %v1204_v2  ;;  %v1209_v7 = vld [vmem:[%s1515_s1 + $0x20] sm:$0xff]   ;;  %v1211_v9 = vld [vmem:[%s1515_s1 + $0x18] sm:$0xff]   ;;  %v1213_v13 = vld [vmem:[%s1515_s1 + $0x10] sm:$0xff]  }
   0x5   :  { %v1220_v11 = vld [vmem:[%s1516_s0 + $0x4] ss:$8 sps:$4 sm:$0xff]   ;;  %v1218_v18 = vld [vmem:[%s1516_s0] ss:$8 sps:$4 sm:$0xff]   ;;  %v1224_v20 = vld [vmem:[%s1516_s0 + $0x14] ss:$8 sps:$4 sm:$0xff]  }
   0x6   :  { %v1223_v12 = vld [vmem:[%s1516_s0 + $0x84] ss:$8 sps:$4 sm:$0xff]   ;;  %435 = vmatprep.mubr.bf16.mxu0 %v1220_v11  ;;  %v1221_v19 = vld [vmem:[%s1516_s0 + $0x80] ss:$8 sps:$4 sm:$0xff]   ;;  %v1226_v21 = vld [vmem:[%s1516_s0 + $0x94] ss:$8 sps:$4 sm:$0xff]  }
   0x7   :  { %1077 = vmatpush3.bf16.msra.mxu0 %v1205_v3  ;;  %1195 = vmatpush3.bf16.msra.mxu1 %v1205_v3  ;;  %v1214_v14 = vld [vmem:[%s1515_s1 + $0x48] sm:$0xff]   ;;  %v1216_v16 = vld [vmem:[%s1515_s1 + $0x40] sm:$0xff]   ;;  %v1228_v22 = vld [vmem:[%s1516_s0 + $0x10] ss:$8 sps:$4 sm:$0xff]  }
   0x8   :  { %1078 = vmatprep.subr.bf16.mxu0 %v1206_v4  ;;  %1188 = vmatprep.subr.bf16.mxu1 %v1206_v4  ;;  %v1215_v15 = vld [vmem:[%s1515_s1 + $0x8] sm:$0xff]   ;;  %v1217_v17 = vld [vmem:[%s1515_s1] sm:$0xff]   ;;  %v1229_v23 = vld [vmem:[%s1516_s0 + $0x90] ss:$8 sps:$4 sm:$0xff]  }
   0x9   :  { %499 = vmatprep.mubr.bf16.mxu1 %v1223_v12  ;;  %v1230_v24 = vld [vmem:[%s1516_s0 + $0x24] ss:$8 sps:$4 sm:$0xff]   ;;  %v1234_v26 = vld [vmem:[%s1516_s0 + $0x20] ss:$8 sps:$4 sm:$0xff]   ;;  %v1236_v28 = vld [vmem:[%s1516_s0 + $0x34] ss:$8 sps:$4 sm:$0xff]  }
   0xa   :  { %v1232_v25 = vld [vmem:[%s1516_s0 + $0xa4] ss:$8 sps:$4 sm:$0xff]   ;;  %v1235_v27 = vld [vmem:[%s1516_s0 + $0xa0] ss:$8 sps:$4 sm:$0xff]   ;;  %v1238_v29 = vld [vmem:[%s1516_s0 + $0xb4] ss:$8 sps:$4 sm:$0xff]  }
   0xb   :  { %1079 = vmatpush3.bf16.msra.mxu0 %v1207_v5  ;;  %1196 = vmatpush3.bf16.msra.mxu1 %v1207_v5  ;;  %v1240_v30 = vld [vmem:[%s1516_s0 + $0x30] ss:$8 sps:$4 sm:$0xff]   ;;  %v1242_v32 = vld [vmem:[%s1516_s0 + $0x44] ss:$8 sps:$4 sm:$0xff]   ;;  %v1246_v34 = vld [vmem:[%s1516_s0 + $0x40] ss:$8 sps:$4 sm:$0xff]  }
   0xc   :  { %1080 = vmatprep.subr.bf16.mxu0 %v1208_v6  ;;  %1189 = vmatprep.subr.bf16.mxu1 %v1208_v6  ;;  %v1241_v31 = vld [vmem:[%s1516_s0 + $0xb0] ss:$8 sps:$4 sm:$0xff]   ;;  %v1244_v33 = vld [vmem:[%s1516_s0 + $0xc4] ss:$8 sps:$4 sm:$0xff]   ;;  %v1247_v35 = vld [vmem:[%s1516_s0 + $0xc0] ss:$8 sps:$4 sm:$0xff]  }
   0xd   :  { %v1248_v36 = vld [vmem:[%s1516_s0 + $0x54] ss:$8 sps:$4 sm:$0xff]   ;;  %v1252_v38 = vld [vmem:[%s1516_s0 + $0x50] ss:$8 sps:$4 sm:$0xff]   ;;  %v1254_v40 = vld [vmem:[%s1516_s0 + $0x64] ss:$8 sps:$4 sm:$0xff]  }
   0xe   :  { %v1250_v37 = vld [vmem:[%s1516_s0 + $0xd4] ss:$8 sps:$4 sm:$0xff]   ;;  %v1253_v39 = vld [vmem:[%s1516_s0 + $0xd0] ss:$8 sps:$4 sm:$0xff]   ;;  %v1256_v41 = vld [vmem:[%s1516_s0 + $0xe4] ss:$8 sps:$4 sm:$0xff]  }
   0xf   :  { %1081 = vmatpush3.bf16.msra.mxu0 %v1209_v7  ;;  %1197 = vmatpush3.bf16.msra.mxu1 %v1209_v7  ;;  %v1258_v42 = vld [vmem:[%s1516_s0 + $0x60] ss:$8 sps:$4 sm:$0xff]   ;;  %v1260_v44 = vld [vmem:[%s1516_s0 + $0x74] ss:$8 sps:$4 sm:$0xff]   ;;  %v1264_v46 = vld [vmem:[%s1516_s0 + $0x70] ss:$8 sps:$4 sm:$0xff]  }
  0x10   :  { %1082 = vmatprep.subr.bf16.mxu0 %v1210_v8  ;;  %1190 = vmatprep.subr.bf16.mxu1 %v1210_v8  ;;  %v1259_v43 = vld [vmem:[%s1516_s0 + $0xe0] ss:$8 sps:$4 sm:$0xff]   ;;  %v1262_v45 = vld [vmem:[%s1516_s0 + $0xf4] ss:$8 sps:$4 sm:$0xff]   ;;  %v1265_v47 = vld [vmem:[%s1516_s0 + $0xf0] ss:$8 sps:$4 sm:$0xff]  }
  0x11   :  { %v1433_v56 = vld [vmem:[%s1517_s2] ss:$0 sm:$0xff] }
  0x13   :  { %1083 = vmatpush3.bf16.msra.mxu0 %v1211_v9  ;;  %1198 = vmatpush3.bf16.msra.mxu1 %v1211_v9 }
  0x14   :  { %1084 = vmatprep.subr.bf16.mxu0 %v1212_v10  ;;  %1191 = vmatprep.subr.bf16.mxu1 %v1212_v10 }
  0x17   :  { %1085 = vmatpush3.bf16.msra.mxu0 %v1213_v13  ;;  %1199 = vmatpush3.bf16.msra.mxu1 %v1213_v13 }
  0x18   :  { %1086 = vmatprep.subr.bf16.mxu0 %v1214_v14  ;;  %1192 = vmatprep.subr.bf16.mxu1 %v1214_v14 }
  0x1b   :  { %1087 = vmatpush3.bf16.msra.mxu0 %v1215_v15  ;;  %1200 = vmatpush3.bf16.msra.mxu1 %v1215_v15 }
  0x1c   :  { %1088 = vmatprep.subr.bf16.mxu0 %v1216_v16  ;;  %1193 = vmatprep.subr.bf16.mxu1 %v1216_v16 }
  0x1f   :  { %1089 = vmatpush3.bf16.msra.mxu0 %v1217_v17  ;;  %1201 = vmatpush3.bf16.msra.mxu1 %v1217_v17 }
  0x22   :  { %436 = vmatmul.mubr.bf16.vlgmr.msra.gmra.mxu0 %v1218_v18  ;;  %500 = vmatmul.mubr.bf16.vlgmr.msra.gmra.mxu1 %v1221_v19 }
  0x23   :  { %443 = vmatprep.mubr.bf16.mxu0 %v1224_v20  ;;  %507 = vmatprep.mubr.bf16.mxu1 %v1226_v21 }
  0x2a   :  { %444 = vmatmul.mubr.bf16.gmra.mxu0 %v1228_v22  ;;  %508 = vmatmul.mubr.bf16.gmra.mxu1 %v1229_v23 }
  0x2b   :  { %451 = vmatprep.mubr.bf16.mxu0 %v1230_v24  ;;  %515 = vmatprep.mubr.bf16.mxu1 %v1232_v25 }
  0x32   :  { %452 = vmatmul.mubr.bf16.gmra.mxu0 %v1234_v26  ;;  %516 = vmatmul.mubr.bf16.gmra.mxu1 %v1235_v27 }
  0x33   :  { %459 = vmatprep.mubr.bf16.mxu0 %v1236_v28  ;;  %523 = vmatprep.mubr.bf16.mxu1 %v1238_v29 }
  0x3a   :  { %460 = vmatmul.mubr.bf16.gmra.mxu0 %v1240_v30  ;;  %524 = vmatmul.mubr.bf16.gmra.mxu1 %v1241_v31 }
  0x3b   :  { %467 = vmatprep.mubr.bf16.mxu0 %v1242_v32  ;;  %531 = vmatprep.mubr.bf16.mxu1 %v1244_v33 }
  0x42   :  { %468 = vmatmul.mubr.bf16.gmra.mxu0 %v1246_v34  ;;  %532 = vmatmul.mubr.bf16.gmra.mxu1 %v1247_v35 }
  0x43   :  { %475 = vmatprep.mubr.bf16.mxu0 %v1248_v36  ;;  %539 = vmatprep.mubr.bf16.mxu1 %v1250_v37 }
  0x4a   :  { %476 = vmatmul.mubr.bf16.gmra.mxu0 %v1252_v38  ;;  %540 = vmatmul.mubr.bf16.gmra.mxu1 %v1253_v39 }
  0x4b   :  { %483 = vmatprep.mubr.bf16.mxu0 %v1254_v40  ;;  %547 = vmatprep.mubr.bf16.mxu1 %v1256_v41 }
  0x52   :  { %484 = vmatmul.mubr.bf16.gmra.mxu0 %v1258_v42  ;;  %548 = vmatmul.mubr.bf16.gmra.mxu1 %v1259_v43 }
  0x53   :  { %491 = vmatprep.mubr.bf16.mxu0 %v1260_v44  ;;  %555 = vmatprep.mubr.bf16.mxu1 %v1262_v45 }
  0x5a   :  { %492 = vmatmul.mubr.bf16.gmra.mxu0 %v1264_v46  ;;  %556 = vmatmul.mubr.bf16.gmra.mxu1 %v1265_v47 }
  0xe2   :  { %v1090_v48 = vpop.f32.mrf.mxu0  ;;  %v1138_v49 = vpop.f32.mrf.mxu1 }
  0xe4   :  { %v1091_v50 = vpop.f32.mrf.mxu0  ;;  %v1139_v51 = vpop.f32.mrf.mxu1 }
  0xe5   :  { %v1092_v54 = vadd.f32 %v1091_v50, %v1090_v48  ;;  %v1140_v55 = vadd.f32 %v1139_v51, %v1138_v49 }
  0xe6   :  { %v1093_v52 = vpop.f32.mrf.mxu0  ;;  %v1141_v53 = vpop.f32.mrf.mxu1 }
  0xe7   :  { %v670_v63 = vadd.f32 %v1092_v54, %v1433_v56  ;;  %v686_v0 = vadd.f32 %v1140_v55, %v1433_v56 }
  0xe8   :  { %v1094_v57 = vpop.f32.mrf.mxu0  ;;  %v1142_v58 = vpop.f32.mrf.mxu1 }
  0xe9   :  { %v1095_v59 = vadd.f32 %v1094_v57, %v1093_v52  ;;  %v1143_v60 = vadd.f32 %v1142_v58, %v1141_v53 }
  0xea   :  { %v1096_v61 = vpop.f32.mrf.mxu0  ;;  %v1144_v62 = vpop.f32.mrf.mxu1 }
  0xeb   :  { %v671_v1 = vadd.f32 %v1095_v59, %v1433_v56  ;;  %v687_v2 = vadd.f32 %v1143_v60, %v1433_v56 }
  0xec   :  { %v1097_v3 = vpop.f32.mrf.mxu0  ;;  %v1145_v4 = vpop.f32.mrf.mxu1 }
  0xed   :  { %v982_v5 = vpack.c.bf16 %v671_v1, %v670_v63  ;;  %v1022_v6 = vpack.c.bf16 %v687_v2, %v686_v0  ;;  %v1098_v9 = vadd.f32 %v1097_v3, %v1096_v61  ;;  %v1146_v10 = vadd.f32 %v1145_v4, %v1144_v62 }
  0xee   :  { %v1099_v7 = vpop.f32.mrf.mxu0  ;;  %v1147_v8 = vpop.f32.mrf.mxu1 }
  0xef   :  { %983 = vst [vmem:[%s1518_s3] sm:$0xff] %v982_v5   ;;  %1066 = vst [vmem:[%s1518_s3 + $0x40] sm:$0xff] %v1022_v6   ;;  %v672_v17 = vadd.f32 %v1098_v9, %v1433_v56  ;;  %v688_v18 = vadd.f32 %v1146_v10, %v1433_v56 }
  0xf0   :  { %v1100_v11 = vpop.f32.mrf.mxu0  ;;  %v1148_v12 = vpop.f32.mrf.mxu1 }
  0xf1   :  { %v1101_v13 = vadd.f32 %v1100_v11, %v1099_v7  ;;  %v1149_v14 = vadd.f32 %v1148_v12, %v1147_v8 }
  0xf2   :  { %v1102_v15 = vpop.f32.mrf.mxu0  ;;  %v1150_v16 = vpop.f32.mrf.mxu1 }
  0xf3   :  { %v673_v19 = vadd.f32 %v1101_v13, %v1433_v56  ;;  %v689_v20 = vadd.f32 %v1149_v14, %v1433_v56 }
  0xf4   :  { %v1103_v21 = vpop.f32.mrf.mxu0  ;;  %v1151_v22 = vpop.f32.mrf.mxu1 }
  0xf5   :  { %v987_v23 = vpack.c.bf16 %v673_v19, %v672_v17  ;;  %v1027_v24 = vpack.c.bf16 %v689_v20, %v688_v18  ;;  %v1104_v27 = vadd.f32 %v1103_v21, %v1102_v15  ;;  %v1152_v28 = vadd.f32 %v1151_v22, %v1150_v16 }
  0xf6   :  { %v1105_v25 = vpop.f32.mrf.mxu0  ;;  %v1153_v26 = vpop.f32.mrf.mxu1 }
  0xf7   :  { %1059 = vst [vmem:[%s1518_s3 + $0x8] sm:$0xff] %v987_v23   ;;  %1067 = vst [vmem:[%s1518_s3 + $0x48] sm:$0xff] %v1027_v24   ;;  %v674_v35 = vadd.f32 %v1104_v27, %v1433_v56  ;;  %v690_v36 = vadd.f32 %v1152_v28, %v1433_v56 }
  0xf8   :  { %v1106_v29 = vpop.f32.mrf.mxu0  ;;  %v1154_v30 = vpop.f32.mrf.mxu1 }
  0xf9   :  { %v1107_v31 = vadd.f32 %v1106_v29, %v1105_v25  ;;  %v1155_v32 = vadd.f32 %v1154_v30, %v1153_v26 }
  0xfa   :  { %v1108_v33 = vpop.f32.mrf.mxu0  ;;  %v1156_v34 = vpop.f32.mrf.mxu1 }
  0xfb   :  { %v675_v37 = vadd.f32 %v1107_v31, %v1433_v56  ;;  %v691_v38 = vadd.f32 %v1155_v32, %v1433_v56 }
  0xfc   :  { %v1109_v39 = vpop.f32.mrf.mxu0  ;;  %v1157_v40 = vpop.f32.mrf.mxu1 }
  0xfd   :  { %v992_v41 = vpack.c.bf16 %v675_v37, %v674_v35  ;;  %v1032_v42 = vpack.c.bf16 %v691_v38, %v690_v36  ;;  %v1110_v45 = vadd.f32 %v1109_v39, %v1108_v33  ;;  %v1158_v46 = vadd.f32 %v1157_v40, %v1156_v34 }
  0xfe   :  { %v1111_v43 = vpop.f32.mrf.mxu0  ;;  %v1159_v44 = vpop.f32.mrf.mxu1 }
  0xff   :  { %1060 = vst [vmem:[%s1518_s3 + $0x10] sm:$0xff] %v992_v41   ;;  %1068 = vst [vmem:[%s1518_s3 + $0x50] sm:$0xff] %v1032_v42   ;;  %v676_v53 = vadd.f32 %v1110_v45, %v1433_v56  ;;  %v692_v54 = vadd.f32 %v1158_v46, %v1433_v56 }
 0x100   :  { %v1112_v47 = vpop.f32.mrf.mxu0  ;;  %v1160_v48 = vpop.f32.mrf.mxu1 }
 0x101   :  { %v1113_v49 = vadd.f32 %v1112_v47, %v1111_v43  ;;  %v1161_v50 = vadd.f32 %v1160_v48, %v1159_v44 }
 0x102   :  { %v1114_v51 = vpop.f32.mrf.mxu0  ;;  %v1162_v52 = vpop.f32.mrf.mxu1 }
 0x103   :  { %v677_v55 = vadd.f32 %v1113_v49, %v1433_v56  ;;  %v693_v57 = vadd.f32 %v1161_v50, %v1433_v56 }
 0x104   :  { %v1115_v58 = vpop.f32.mrf.mxu0  ;;  %v1163_v59 = vpop.f32.mrf.mxu1 }
 0x105   :  { %v997_v60 = vpack.c.bf16 %v677_v55, %v676_v53  ;;  %v1037_v61 = vpack.c.bf16 %v693_v57, %v692_v54  ;;  %v1116_v0 = vadd.f32 %v1115_v58, %v1114_v51  ;;  %v1164_v1 = vadd.f32 %v1163_v59, %v1162_v52 }
 0x106   :  { %v1117_v62 = vpop.f32.mrf.mxu0  ;;  %v1165_v63 = vpop.f32.mrf.mxu1 }
 0x107   :  { %1061 = vst [vmem:[%s1518_s3 + $0x18] sm:$0xff] %v997_v60   ;;  %1069 = vst [vmem:[%s1518_s3 + $0x58] sm:$0xff] %v1037_v61   ;;  %v678_v8 = vadd.f32 %v1116_v0, %v1433_v56  ;;  %v694_v9 = vadd.f32 %v1164_v1, %v1433_v56 }
 0x108   :  { %v1118_v2 = vpop.f32.mrf.mxu0  ;;  %v1166_v3 = vpop.f32.mrf.mxu1 }
 0x109   :  { %v1119_v4 = vadd.f32 %v1118_v2, %v1117_v62  ;;  %v1167_v5 = vadd.f32 %v1166_v3, %v1165_v63 }
 0x10a   :  { %v1120_v6 = vpop.f32.mrf.mxu0  ;;  %v1168_v7 = vpop.f32.mrf.mxu1 }
 0x10b   :  { %v679_v10 = vadd.f32 %v1119_v4, %v1433_v56  ;;  %v695_v11 = vadd.f32 %v1167_v5, %v1433_v56 }
 0x10c   :  { %v1121_v12 = vpop.f32.mrf.mxu0  ;;  %v1169_v13 = vpop.f32.mrf.mxu1 }
 0x10d   :  { %v1002_v14 = vpack.c.bf16 %v679_v10, %v678_v8  ;;  %v1042_v15 = vpack.c.bf16 %v695_v11, %v694_v9  ;;  %v1122_v18 = vadd.f32 %v1121_v12, %v1120_v6  ;;  %v1170_v19 = vadd.f32 %v1169_v13, %v1168_v7 }
 0x10e   :  { %v1123_v16 = vpop.f32.mrf.mxu0  ;;  %v1171_v17 = vpop.f32.mrf.mxu1 }
 0x10f   :  { %1062 = vst [vmem:[%s1518_s3 + $0x20] sm:$0xff] %v1002_v14   ;;  %1070 = vst [vmem:[%s1518_s3 + $0x60] sm:$0xff] %v1042_v15   ;;  %v680_v26 = vadd.f32 %v1122_v18, %v1433_v56  ;;  %v696_v27 = vadd.f32 %v1170_v19, %v1433_v56 }
 0x110   :  { %v1124_v20 = vpop.f32.mrf.mxu0  ;;  %v1172_v21 = vpop.f32.mrf.mxu1 }
 0x111   :  { %v1125_v22 = vadd.f32 %v1124_v20, %v1123_v16  ;;  %v1173_v23 = vadd.f32 %v1172_v21, %v1171_v17 }
 0x112   :  { %v1126_v24 = vpop.f32.mrf.mxu0  ;;  %v1174_v25 = vpop.f32.mrf.mxu1 }
 0x113   :  { %v681_v28 = vadd.f32 %v1125_v22, %v1433_v56  ;;  %v697_v29 = vadd.f32 %v1173_v23, %v1433_v56 }
 0x114   :  { %v1127_v30 = vpop.f32.mrf.mxu0  ;;  %v1175_v31 = vpop.f32.mrf.mxu1 }
 0x115   :  { %v1007_v32 = vpack.c.bf16 %v681_v28, %v680_v26  ;;  %v1047_v33 = vpack.c.bf16 %v697_v29, %v696_v27  ;;  %v1128_v36 = vadd.f32 %v1127_v30, %v1126_v24  ;;  %v1176_v37 = vadd.f32 %v1175_v31, %v1174_v25 }
 0x116   :  { %v1129_v34 = vpop.f32.mrf.mxu0  ;;  %v1177_v35 = vpop.f32.mrf.mxu1 }
 0x117   :  { %1063 = vst [vmem:[%s1518_s3 + $0x28] sm:$0xff] %v1007_v32   ;;  %1071 = vst [vmem:[%s1518_s3 + $0x68] sm:$0xff] %v1047_v33   ;;  %v682_v44 = vadd.f32 %v1128_v36, %v1433_v56  ;;  %v698_v45 = vadd.f32 %v1176_v37, %v1433_v56 }
 0x118   :  { %v1130_v38 = vpop.f32.mrf.mxu0  ;;  %v1178_v39 = vpop.f32.mrf.mxu1 }
 0x119   :  { %v1131_v40 = vadd.f32 %v1130_v38, %v1129_v34  ;;  %v1179_v41 = vadd.f32 %v1178_v39, %v1177_v35 }
 0x11a   :  { %v1132_v42 = vpop.f32.mrf.mxu0  ;;  %v1180_v43 = vpop.f32.mrf.mxu1 }
 0x11b   :  { %v683_v46 = vadd.f32 %v1131_v40, %v1433_v56  ;;  %v699_v47 = vadd.f32 %v1179_v41, %v1433_v56 }
 0x11c   :  { %v1133_v48 = vpop.f32.mrf.mxu0  ;;  %v1181_v49 = vpop.f32.mrf.mxu1 }
 0x11d   :  { %v1012_v50 = vpack.c.bf16 %v683_v46, %v682_v44  ;;  %v1052_v51 = vpack.c.bf16 %v699_v47, %v698_v45  ;;  %v1134_v54 = vadd.f32 %v1133_v48, %v1132_v42  ;;  %v1182_v55 = vadd.f32 %v1181_v49, %v1180_v43 }
 0x11e   :  { %v1135_v52 = vpop.f32.mrf.mxu0  ;;  %v1183_v53 = vpop.f32.mrf.mxu1 }
 0x11f   :  { %1064 = vst [vmem:[%s1518_s3 + $0x30] sm:$0xff] %v1012_v50   ;;  %1072 = vst [vmem:[%s1518_s3 + $0x70] sm:$0xff] %v1052_v51   ;;  %v684_v61 = vadd.f32 %v1134_v54, %v1433_v56  ;;  %v700_v62 = vadd.f32 %v1182_v55, %v1433_v56 }
 0x120   :  { %v1136_v57 = vpop.f32.mrf.mxu0  ;;  %v1184_v58 = vpop.f32.mrf.mxu1 }
 0x121   :  { %v1137_v59 = vadd.f32 %v1136_v57, %v1135_v52  ;;  %v1185_v60 = vadd.f32 %v1184_v58, %v1183_v53 }
 0x123   :  { %v685_v63 = vadd.f32 %v1137_v59, %v1433_v56  ;;  %v701_v0 = vadd.f32 %v1185_v60, %v1433_v56 }
 0x125   :  { %v1017_v1 = vpack.c.bf16 %v685_v63, %v684_v61  ;;  %v1057_v2 = vpack.c.bf16 %v701_v0, %v700_v62 }
 0x127   :  { %1065 = vst [vmem:[%s1518_s3 + $0x38] sm:$0xff] %v1017_v1   ;;  %1073 = vst [vmem:[%s1518_s3 + $0x78] sm:$0xff] %v1057_v2  }

// kernel: gcn_forward.6
= control target key start
LH: loop header
LB: loop body
LE: loop exit
PB: predicated region body
PF: predicated region fallthrough
CT: control target
= control target key end

     0   :  { %s1211_s1 = inlined_call_operand.vmem [shape: bf16[128,128], index: 1, kind: input, shape index: {}]   ;;  %s1212_s0 = inlined_call_operand.vmem [shape: bf16[256,128], index: 0, kind: input, shape index: {}]   ;;  %s1213_s2 = inlined_call_operand.vmem [shape: f32[1,128], index: 2, kind: input, shape index: {}]   ;;  %s1214_s3 = inlined_call_operand.vmem [shape: bf16[256,128], index: 3, kind: output, shape index: {}]  }
   0x1   :  { %v1010_v0 = vld [vmem:[%s1211_s1 + $0x38] sm:$0xff]   ;;  %v1011_v1 = vld [vmem:[%s1211_s1 + $0x30] sm:$0xff]   ;;  %v1012_v2 = vld [vmem:[%s1211_s1 + $0x28] sm:$0xff]  }
   0x2   :  { %946 = vmatprep.subr.bf16.mxu0 %v1010_v0  ;;  %994 = vmatprep.subr.bf16.mxu1 %v1010_v0  ;;  %v1013_v3 = vld [vmem:[%s1211_s1 + $0x20] sm:$0xff]   ;;  %v1014_v6 = vld [vmem:[%s1211_s1 + $0x18] sm:$0xff]   ;;  %v1015_v7 = vld [vmem:[%s1211_s1 + $0x10] sm:$0xff]  }
   0x3   :  { %947 = vmatpush3.bf16.msra.mxu0 %v1010_v0  ;;  %1002 = vmatpush3.bf16.msra.mxu1 %v1010_v0  ;;  %v1018_v4 = vld [vmem:[%s1212_s0] sm:$0xff]   ;;  %v1016_v8 = vld [vmem:[%s1211_s1 + $0x8] sm:$0xff]   ;;  %v1022_v12 = vld [vmem:[%s1212_s0 + $0x10] sm:$0xff]  }
   0x4   :  { %948 = vmatprep.subr.bf16.mxu0 %v1011_v1  ;;  %995 = vmatprep.subr.bf16.mxu1 %v1011_v1  ;;  %v1019_v5 = vld [vmem:[%s1212_s0 + $0x40] sm:$0xff]   ;;  %v1020_v10 = vld [vmem:[%s1212_s0 + $0x8] sm:$0xff]   ;;  %v1023_v13 = vld [vmem:[%s1212_s0 + $0x50] sm:$0xff]  }
   0x5   :  { %962 = vmatprep.mubr.bf16.mxu0 %v1018_v4  ;;  %978 = vmatprep.mubr.bf16.mxu1 %v1019_v5  ;;  %v1017_v9 = vld [vmem:[%s1211_s1] sm:$0xff]   ;;  %v1021_v11 = vld [vmem:[%s1212_s0 + $0x48] sm:$0xff]   ;;  %v1024_v14 = vld [vmem:[%s1212_s0 + $0x18] sm:$0xff]  }
   0x6   :  { %v1025_v15 = vld [vmem:[%s1212_s0 + $0x58] sm:$0xff]   ;;  %v1026_v16 = vld [vmem:[%s1212_s0 + $0x20] sm:$0xff]   ;;  %v1028_v18 = vld [vmem:[%s1212_s0 + $0x28] sm:$0xff]  }
   0x7   :  { %949 = vmatpush3.bf16.msra.mxu0 %v1011_v1  ;;  %1003 = vmatpush3.bf16.msra.mxu1 %v1011_v1  ;;  %v1027_v17 = vld [vmem:[%s1212_s0 + $0x60] sm:$0xff]   ;;  %v1029_v19 = vld [vmem:[%s1212_s0 + $0x68] sm:$0xff]   ;;  %v1030_v20 = vld [vmem:[%s1212_s0 + $0x30] sm:$0xff]  }
   0x8   :  { %950 = vmatprep.subr.bf16.mxu0 %v1012_v2  ;;  %996 = vmatprep.subr.bf16.mxu1 %v1012_v2  ;;  %v1031_v21 = vld [vmem:[%s1212_s0 + $0x70] sm:$0xff]   ;;  %v1032_v22 = vld [vmem:[%s1212_s0 + $0x38] sm:$0xff]   ;;  %v1129_v26 = vld [vmem:[%s1213_s2] ss:$0 sm:$0xff] }
   0x9   :  { %v1033_v23 = vld [vmem:[%s1212_s0 + $0x78] sm:$0xff]  }
   0xb   :  { %951 = vmatpush3.bf16.msra.mxu0 %v1012_v2  ;;  %1004 = vmatpush3.bf16.msra.mxu1 %v1012_v2 }
   0xc   :  { %952 = vmatprep.subr.bf16.mxu0 %v1013_v3  ;;  %997 = vmatprep.subr.bf16.mxu1 %v1013_v3 }
   0xf   :  { %953 = vmatpush3.bf16.msra.mxu0 %v1013_v3  ;;  %1005 = vmatpush3.bf16.msra.mxu1 %v1013_v3 }
  0x10   :  { %954 = vmatprep.subr.bf16.mxu0 %v1014_v6  ;;  %998 = vmatprep.subr.bf16.mxu1 %v1014_v6 }
  0x13   :  { %955 = vmatpush3.bf16.msra.mxu0 %v1014_v6  ;;  %1006 = vmatpush3.bf16.msra.mxu1 %v1014_v6 }
  0x14   :  { %956 = vmatprep.subr.bf16.mxu0 %v1015_v7  ;;  %999 = vmatprep.subr.bf16.mxu1 %v1015_v7 }
  0x17   :  { %957 = vmatpush3.bf16.msra.mxu0 %v1015_v7  ;;  %1007 = vmatpush3.bf16.msra.mxu1 %v1015_v7 }
  0x18   :  { %958 = vmatprep.subr.bf16.mxu0 %v1016_v8  ;;  %1000 = vmatprep.subr.bf16.mxu1 %v1016_v8 }
  0x1b   :  { %959 = vmatpush3.bf16.msra.mxu0 %v1016_v8  ;;  %1008 = vmatpush3.bf16.msra.mxu1 %v1016_v8 }
  0x1c   :  { %960 = vmatprep.subr.bf16.mxu0 %v1017_v9  ;;  %1001 = vmatprep.subr.bf16.mxu1 %v1017_v9 }
  0x1f   :  { %961 = vmatpush3.bf16.msra.mxu0 %v1017_v9  ;;  %1009 = vmatpush3.bf16.msra.mxu1 %v1017_v9 }
  0x22   :  { %963 = vmatmul.mubr.bf16.vlgmr.msra.gmra.mxu0 %v1020_v10  ;;  %979 = vmatmul.mubr.bf16.vlgmr.msra.gmra.mxu1 %v1021_v11 }
  0x23   :  { %966 = vmatprep.mubr.bf16.mxu0 %v1022_v12  ;;  %982 = vmatprep.mubr.bf16.mxu1 %v1023_v13 }
  0x2a   :  { %967 = vmatmul.mubr.bf16.gmra.mxu0 %v1024_v14  ;;  %983 = vmatmul.mubr.bf16.gmra.mxu1 %v1025_v15 }
  0x2b   :  { %970 = vmatprep.mubr.bf16.mxu0 %v1026_v16  ;;  %986 = vmatprep.mubr.bf16.mxu1 %v1027_v17 }
  0x32   :  { %971 = vmatmul.mubr.bf16.gmra.mxu0 %v1028_v18  ;;  %987 = vmatmul.mubr.bf16.gmra.mxu1 %v1029_v19 }
  0x33   :  { %974 = vmatprep.mubr.bf16.mxu0 %v1030_v20  ;;  %990 = vmatprep.mubr.bf16.mxu1 %v1031_v21 }
  0x3a   :  { %975 = vmatmul.mubr.bf16.gmra.mxu0 %v1032_v22  ;;  %991 = vmatmul.mubr.bf16.gmra.mxu1 %v1033_v23 }
  0xe2   :  { %v964_v24 = vpop.f32.mrf.mxu0  ;;  %v980_v25 = vpop.f32.mrf.mxu1 }
  0xe3   :  { %v544_v31 = vadd.f32 %v964_v24, %v1129_v26  ;;  %v560_v32 = vadd.f32 %v980_v25, %v1129_v26 }
  0xe4   :  { %v309_v27 = vpop.f32.mrf.mxu0  ;;  %v373_v28 = vpop.f32.mrf.mxu1 }
  0xe5   :  { %v542_v35 = vadd.f32 %v1129_v26, %v309_v27  ;;  %v558_v36 = vadd.f32 %v1129_v26, %v373_v28 }
  0xe6   :  { %v965_v29 = vpop.f32.mrf.mxu0  ;;  %v981_v30 = vpop.f32.mrf.mxu1 }
  0xe7   :  { %v545_v33 = vadd.f32 %v965_v29, %v1129_v26  ;;  %v561_v34 = vadd.f32 %v981_v30, %v1129_v26 }
  0xe8   :  { %v312_v37 = vpop.f32.mrf.mxu0  ;;  %v376_v38 = vpop.f32.mrf.mxu1 }
  0xe9   :  { %v835_v39 = vpack.c.bf16 %v545_v33, %v544_v31  ;;  %v875_v40 = vpack.c.bf16 %v561_v34, %v560_v32  ;;  %v543_v41 = vadd.f32 %v1129_v26, %v312_v37  ;;  %v559_v42 = vadd.f32 %v1129_v26, %v376_v38 }
  0xea   :  { %v968_v43 = vpop.f32.mrf.mxu0  ;;  %v984_v44 = vpop.f32.mrf.mxu1 }
  0xeb   :  { %907 = vst [vmem:[%s1214_s3 + $0x8] sm:$0xff] %v835_v39   ;;  %915 = vst [vmem:[%s1214_s3 + $0x48] sm:$0xff] %v875_v40   ;;  %v830_v45 = vpack.c.bf16 %v543_v41, %v542_v35  ;;  %v870_v46 = vpack.c.bf16 %v559_v42, %v558_v36  ;;  %v548_v51 = vadd.f32 %v968_v43, %v1129_v26 }
  0xec   :  { %v325_v47 = vpop.f32.mrf.mxu0  ;;  %v389_v48 = vpop.f32.mrf.mxu1  ;;  %v564_v52 = vadd.f32 %v984_v44, %v1129_v26 }
  0xed   :  { %831 = vst [vmem:[%s1214_s3] sm:$0xff] %v830_v45   ;;  %914 = vst [vmem:[%s1214_s3 + $0x40] sm:$0xff] %v870_v46   ;;  %v546_v55 = vadd.f32 %v1129_v26, %v325_v47  ;;  %v562_v56 = vadd.f32 %v1129_v26, %v389_v48 }
  0xee   :  { %v969_v49 = vpop.f32.mrf.mxu0  ;;  %v985_v50 = vpop.f32.mrf.mxu1 }
  0xef   :  { %v549_v53 = vadd.f32 %v969_v49, %v1129_v26  ;;  %v565_v54 = vadd.f32 %v985_v50, %v1129_v26 }
  0xf0   :  { %v328_v57 = vpop.f32.mrf.mxu0  ;;  %v392_v58 = vpop.f32.mrf.mxu1 }
  0xf1   :  { %v845_v59 = vpack.c.bf16 %v549_v53, %v548_v51  ;;  %v885_v60 = vpack.c.bf16 %v565_v54, %v564_v52  ;;  %v547_v61 = vadd.f32 %v1129_v26, %v328_v57  ;;  %v563_v62 = vadd.f32 %v1129_v26, %v392_v58 }
  0xf2   :  { %v972_v63 = vpop.f32.mrf.mxu0  ;;  %v988_v0 = vpop.f32.mrf.mxu1 }
  0xf3   :  { %909 = vst [vmem:[%s1214_s3 + $0x18] sm:$0xff] %v845_v59   ;;  %917 = vst [vmem:[%s1214_s3 + $0x58] sm:$0xff] %v885_v60   ;;  %v840_v1 = vpack.c.bf16 %v547_v61, %v546_v55  ;;  %v880_v2 = vpack.c.bf16 %v563_v62, %v562_v56  ;;  %v552_v7 = vadd.f32 %v972_v63, %v1129_v26 }
  0xf4   :  { %v341_v3 = vpop.f32.mrf.mxu0  ;;  %v405_v4 = vpop.f32.mrf.mxu1  ;;  %v568_v8 = vadd.f32 %v988_v0, %v1129_v26 }
  0xf5   :  { %908 = vst [vmem:[%s1214_s3 + $0x10] sm:$0xff] %v840_v1   ;;  %916 = vst [vmem:[%s1214_s3 + $0x50] sm:$0xff] %v880_v2   ;;  %v550_v11 = vadd.f32 %v1129_v26, %v341_v3  ;;  %v566_v12 = vadd.f32 %v1129_v26, %v405_v4 }
  0xf6   :  { %v973_v5 = vpop.f32.mrf.mxu0  ;;  %v989_v6 = vpop.f32.mrf.mxu1 }
  0xf7   :  { %v553_v9 = vadd.f32 %v973_v5, %v1129_v26  ;;  %v569_v10 = vadd.f32 %v989_v6, %v1129_v26 }
  0xf8   :  { %v344_v13 = vpop.f32.mrf.mxu0  ;;  %v408_v14 = vpop.f32.mrf.mxu1 }
  0xf9   :  { %v855_v15 = vpack.c.bf16 %v553_v9, %v552_v7  ;;  %v895_v16 = vpack.c.bf16 %v569_v10, %v568_v8  ;;  %v551_v17 = vadd.f32 %v1129_v26, %v344_v13  ;;  %v567_v18 = vadd.f32 %v1129_v26, %v408_v14 }
  0xfa   :  { %v976_v19 = vpop.f32.mrf.mxu0  ;;  %v992_v20 = vpop.f32.mrf.mxu1 }
  0xfb   :  { %911 = vst [vmem:[%s1214_s3 + $0x28] sm:$0xff] %v855_v15   ;;  %919 = vst [vmem:[%s1214_s3 + $0x68] sm:$0xff] %v895_v16   ;;  %v850_v21 = vpack.c.bf16 %v551_v17, %v550_v11  ;;  %v890_v22 = vpack.c.bf16 %v567_v18, %v566_v12  ;;  %v556_v28 = vadd.f32 %v976_v19, %v1129_v26 }
  0xfc   :  { %v357_v23 = vpop.f32.mrf.mxu0  ;;  %v421_v24 = vpop.f32.mrf.mxu1  ;;  %v572_v29 = vadd.f32 %v992_v20, %v1129_v26 }
  0xfd   :  { %910 = vst [vmem:[%s1214_s3 + $0x20] sm:$0xff] %v850_v21   ;;  %918 = vst [vmem:[%s1214_s3 + $0x60] sm:$0xff] %v890_v22   ;;  %v554_v32 = vadd.f32 %v1129_v26, %v357_v23  ;;  %v570_v33 = vadd.f32 %v1129_v26, %v421_v24 }
  0xfe   :  { %v977_v25 = vpop.f32.mrf.mxu0  ;;  %v993_v27 = vpop.f32.mrf.mxu1 }
  0xff   :  { %v557_v30 = vadd.f32 %v977_v25, %v1129_v26  ;;  %v573_v31 = vadd.f32 %v993_v27, %v1129_v26 }
 0x100   :  { %v360_v34 = vpop.f32.mrf.mxu0  ;;  %v424_v35 = vpop.f32.mrf.mxu1 }
 0x101   :  { %v865_v36 = vpack.c.bf16 %v557_v30, %v556_v28  ;;  %v905_v37 = vpack.c.bf16 %v573_v31, %v572_v29  ;;  %v555_v38 = vadd.f32 %v1129_v26, %v360_v34  ;;  %v571_v39 = vadd.f32 %v1129_v26, %v424_v35 }
 0x103   :  { %913 = vst [vmem:[%s1214_s3 + $0x38] sm:$0xff] %v865_v36   ;;  %921 = vst [vmem:[%s1214_s3 + $0x78] sm:$0xff] %v905_v37   ;;  %v860_v40 = vpack.c.bf16 %v555_v38, %v554_v32  ;;  %v900_v41 = vpack.c.bf16 %v571_v39, %v570_v33 }
 0x105   :  { %912 = vst [vmem:[%s1214_s3 + $0x30] sm:$0xff] %v860_v40   ;;  %920 = vst [vmem:[%s1214_s3 + $0x70] sm:$0xff] %v900_v41  }

// kernel: gcn_forward.5
= control target key start
LH: loop header
LB: loop body
LE: loop exit
PB: predicated region body
PF: predicated region fallthrough
CT: control target
= control target key end

     0   :  { %s1547_s1 = inlined_call_operand.vmem [shape: bf16[256,128], index: 1, kind: input, shape index: {}]   ;;  %s1548_s0 = inlined_call_operand.vmem [shape: bf16[256,256], index: 0, kind: input, shape index: {}]   ;;  %s1549_s2 = inlined_call_operand.vmem [shape: f32[1,128], index: 2, kind: input, shape index: {}]   ;;  %s1550_s3 = inlined_call_operand.vmem [shape: bf16[256,128], index: 3, kind: output, shape index: {}]  }
   0x1   :  { %v1234_v0 = vld [vmem:[%s1547_s1 + $0x78] sm:$0xff]   ;;  %v1236_v2 = vld [vmem:[%s1547_s1 + $0x70] sm:$0xff]   ;;  %v1238_v4 = vld [vmem:[%s1547_s1 + $0x68] sm:$0xff]  }
   0x2   :  { %v1235_v1 = vld [vmem:[%s1547_s1 + $0x38] sm:$0xff]   ;;  %1106 = vmatprep.subr.bf16.mxu0 %v1234_v0  ;;  %1218 = vmatprep.subr.bf16.mxu1 %v1234_v0  ;;  %v1237_v3 = vld [vmem:[%s1547_s1 + $0x30] sm:$0xff]   ;;  %v1239_v5 = vld [vmem:[%s1547_s1 + $0x28] sm:$0xff]  }
   0x3   :  { %1107 = vmatpush3.bf16.msra.mxu0 %v1235_v1  ;;  %1226 = vmatpush3.bf16.msra.mxu1 %v1235_v1  ;;  %v1240_v6 = vld [vmem:[%s1547_s1 + $0x60] sm:$0xff]   ;;  %v1242_v8 = vld [vmem:[%s1547_s1 + $0x58] sm:$0xff]   ;;  %v1244_v10 = vld [vmem:[%s1547_s1 + $0x50] sm:$0xff]  }
   0x4   :  { %1108 = vmatprep.subr.bf16.mxu0 %v1236_v2  ;;  %1219 = vmatprep.subr.bf16.mxu1 %v1236_v2  ;;  %v1241_v7 = vld [vmem:[%s1547_s1 + $0x20] sm:$0xff]   ;;  %v1243_v9 = vld [vmem:[%s1547_s1 + $0x18] sm:$0xff]   ;;  %v1245_v13 = vld [vmem:[%s1547_s1 + $0x10] sm:$0xff]  }
   0x5   :  { %v1252_v11 = vld [vmem:[%s1548_s0 + $0x4] ss:$8 sps:$4 sm:$0xff]   ;;  %v1250_v18 = vld [vmem:[%s1548_s0] ss:$8 sps:$4 sm:$0xff]   ;;  %v1256_v20 = vld [vmem:[%s1548_s0 + $0x14] ss:$8 sps:$4 sm:$0xff]  }
   0x6   :  { %v1255_v12 = vld [vmem:[%s1548_s0 + $0x84] ss:$8 sps:$4 sm:$0xff]   ;;  %435 = vmatprep.mubr.bf16.mxu0 %v1252_v11  ;;  %v1253_v19 = vld [vmem:[%s1548_s0 + $0x80] ss:$8 sps:$4 sm:$0xff]   ;;  %v1258_v21 = vld [vmem:[%s1548_s0 + $0x94] ss:$8 sps:$4 sm:$0xff]  }
   0x7   :  { %1109 = vmatpush3.bf16.msra.mxu0 %v1237_v3  ;;  %1227 = vmatpush3.bf16.msra.mxu1 %v1237_v3  ;;  %v1246_v14 = vld [vmem:[%s1547_s1 + $0x48] sm:$0xff]   ;;  %v1248_v16 = vld [vmem:[%s1547_s1 + $0x40] sm:$0xff]   ;;  %v1260_v22 = vld [vmem:[%s1548_s0 + $0x10] ss:$8 sps:$4 sm:$0xff]  }
   0x8   :  { %1110 = vmatprep.subr.bf16.mxu0 %v1238_v4  ;;  %1220 = vmatprep.subr.bf16.mxu1 %v1238_v4  ;;  %v1247_v15 = vld [vmem:[%s1547_s1 + $0x8] sm:$0xff]   ;;  %v1249_v17 = vld [vmem:[%s1547_s1] sm:$0xff]   ;;  %v1261_v23 = vld [vmem:[%s1548_s0 + $0x90] ss:$8 sps:$4 sm:$0xff]  }
   0x9   :  { %499 = vmatprep.mubr.bf16.mxu1 %v1255_v12  ;;  %v1262_v24 = vld [vmem:[%s1548_s0 + $0x24] ss:$8 sps:$4 sm:$0xff]   ;;  %v1266_v26 = vld [vmem:[%s1548_s0 + $0x20] ss:$8 sps:$4 sm:$0xff]   ;;  %v1268_v28 = vld [vmem:[%s1548_s0 + $0x34] ss:$8 sps:$4 sm:$0xff]  }
   0xa   :  { %v1264_v25 = vld [vmem:[%s1548_s0 + $0xa4] ss:$8 sps:$4 sm:$0xff]   ;;  %v1267_v27 = vld [vmem:[%s1548_s0 + $0xa0] ss:$8 sps:$4 sm:$0xff]   ;;  %v1270_v29 = vld [vmem:[%s1548_s0 + $0xb4] ss:$8 sps:$4 sm:$0xff]  }
   0xb   :  { %1111 = vmatpush3.bf16.msra.mxu0 %v1239_v5  ;;  %1228 = vmatpush3.bf16.msra.mxu1 %v1239_v5  ;;  %v1272_v30 = vld [vmem:[%s1548_s0 + $0x30] ss:$8 sps:$4 sm:$0xff]   ;;  %v1274_v32 = vld [vmem:[%s1548_s0 + $0x44] ss:$8 sps:$4 sm:$0xff]   ;;  %v1278_v34 = vld [vmem:[%s1548_s0 + $0x40] ss:$8 sps:$4 sm:$0xff]  }
   0xc   :  { %1112 = vmatprep.subr.bf16.mxu0 %v1240_v6  ;;  %1221 = vmatprep.subr.bf16.mxu1 %v1240_v6  ;;  %v1273_v31 = vld [vmem:[%s1548_s0 + $0xb0] ss:$8 sps:$4 sm:$0xff]   ;;  %v1276_v33 = vld [vmem:[%s1548_s0 + $0xc4] ss:$8 sps:$4 sm:$0xff]   ;;  %v1279_v35 = vld [vmem:[%s1548_s0 + $0xc0] ss:$8 sps:$4 sm:$0xff]  }
   0xd   :  { %v1280_v36 = vld [vmem:[%s1548_s0 + $0x54] ss:$8 sps:$4 sm:$0xff]   ;;  %v1284_v38 = vld [vmem:[%s1548_s0 + $0x50] ss:$8 sps:$4 sm:$0xff]   ;;  %v1286_v40 = vld [vmem:[%s1548_s0 + $0x64] ss:$8 sps:$4 sm:$0xff]  }
   0xe   :  { %v1282_v37 = vld [vmem:[%s1548_s0 + $0xd4] ss:$8 sps:$4 sm:$0xff]   ;;  %v1285_v39 = vld [vmem:[%s1548_s0 + $0xd0] ss:$8 sps:$4 sm:$0xff]   ;;  %v1288_v41 = vld [vmem:[%s1548_s0 + $0xe4] ss:$8 sps:$4 sm:$0xff]  }
   0xf   :  { %1113 = vmatpush3.bf16.msra.mxu0 %v1241_v7  ;;  %1229 = vmatpush3.bf16.msra.mxu1 %v1241_v7  ;;  %v1290_v42 = vld [vmem:[%s1548_s0 + $0x60] ss:$8 sps:$4 sm:$0xff]   ;;  %v1292_v44 = vld [vmem:[%s1548_s0 + $0x74] ss:$8 sps:$4 sm:$0xff]   ;;  %v1296_v46 = vld [vmem:[%s1548_s0 + $0x70] ss:$8 sps:$4 sm:$0xff]  }
  0x10   :  { %1114 = vmatprep.subr.bf16.mxu0 %v1242_v8  ;;  %1222 = vmatprep.subr.bf16.mxu1 %v1242_v8  ;;  %v1291_v43 = vld [vmem:[%s1548_s0 + $0xe0] ss:$8 sps:$4 sm:$0xff]   ;;  %v1294_v45 = vld [vmem:[%s1548_s0 + $0xf4] ss:$8 sps:$4 sm:$0xff]   ;;  %v1297_v47 = vld [vmem:[%s1548_s0 + $0xf0] ss:$8 sps:$4 sm:$0xff]  }
  0x11   :  { %v1465_v53 = vld [vmem:[%s1549_s2] ss:$0 sm:$0xff] }
  0x13   :  { %1115 = vmatpush3.bf16.msra.mxu0 %v1243_v9  ;;  %1230 = vmatpush3.bf16.msra.mxu1 %v1243_v9 }
  0x14   :  { %1116 = vmatprep.subr.bf16.mxu0 %v1244_v10  ;;  %1223 = vmatprep.subr.bf16.mxu1 %v1244_v10 }
  0x17   :  { %1117 = vmatpush3.bf16.msra.mxu0 %v1245_v13  ;;  %1231 = vmatpush3.bf16.msra.mxu1 %v1245_v13 }
  0x18   :  { %1118 = vmatprep.subr.bf16.mxu0 %v1246_v14  ;;  %1224 = vmatprep.subr.bf16.mxu1 %v1246_v14 }
  0x1b   :  { %1119 = vmatpush3.bf16.msra.mxu0 %v1247_v15  ;;  %1232 = vmatpush3.bf16.msra.mxu1 %v1247_v15 }
  0x1c   :  { %1120 = vmatprep.subr.bf16.mxu0 %v1248_v16  ;;  %1225 = vmatprep.subr.bf16.mxu1 %v1248_v16 }
  0x1f   :  { %1121 = vmatpush3.bf16.msra.mxu0 %v1249_v17  ;;  %1233 = vmatpush3.bf16.msra.mxu1 %v1249_v17 }
  0x22   :  { %436 = vmatmul.mubr.bf16.vlgmr.msra.gmra.mxu0 %v1250_v18  ;;  %500 = vmatmul.mubr.bf16.vlgmr.msra.gmra.mxu1 %v1253_v19 }
  0x23   :  { %443 = vmatprep.mubr.bf16.mxu0 %v1256_v20  ;;  %507 = vmatprep.mubr.bf16.mxu1 %v1258_v21 }
  0x2a   :  { %444 = vmatmul.mubr.bf16.gmra.mxu0 %v1260_v22  ;;  %508 = vmatmul.mubr.bf16.gmra.mxu1 %v1261_v23 }
  0x2b   :  { %451 = vmatprep.mubr.bf16.mxu0 %v1262_v24  ;;  %515 = vmatprep.mubr.bf16.mxu1 %v1264_v25 }
  0x32   :  { %452 = vmatmul.mubr.bf16.gmra.mxu0 %v1266_v26  ;;  %516 = vmatmul.mubr.bf16.gmra.mxu1 %v1267_v27 }
  0x33   :  { %459 = vmatprep.mubr.bf16.mxu0 %v1268_v28  ;;  %523 = vmatprep.mubr.bf16.mxu1 %v1270_v29 }
  0x3a   :  { %460 = vmatmul.mubr.bf16.gmra.mxu0 %v1272_v30  ;;  %524 = vmatmul.mubr.bf16.gmra.mxu1 %v1273_v31 }
  0x3b   :  { %467 = vmatprep.mubr.bf16.mxu0 %v1274_v32  ;;  %531 = vmatprep.mubr.bf16.mxu1 %v1276_v33 }
  0x42   :  { %468 = vmatmul.mubr.bf16.gmra.mxu0 %v1278_v34  ;;  %532 = vmatmul.mubr.bf16.gmra.mxu1 %v1279_v35 }
  0x43   :  { %475 = vmatprep.mubr.bf16.mxu0 %v1280_v36  ;;  %539 = vmatprep.mubr.bf16.mxu1 %v1282_v37 }
  0x4a   :  { %476 = vmatmul.mubr.bf16.gmra.mxu0 %v1284_v38  ;;  %540 = vmatmul.mubr.bf16.gmra.mxu1 %v1285_v39 }
  0x4b   :  { %483 = vmatprep.mubr.bf16.mxu0 %v1286_v40  ;;  %547 = vmatprep.mubr.bf16.mxu1 %v1288_v41 }
  0x52   :  { %484 = vmatmul.mubr.bf16.gmra.mxu0 %v1290_v42  ;;  %548 = vmatmul.mubr.bf16.gmra.mxu1 %v1291_v43 }
  0x53   :  { %491 = vmatprep.mubr.bf16.mxu0 %v1292_v44  ;;  %555 = vmatprep.mubr.bf16.mxu1 %v1294_v45 }
  0x5a   :  { %492 = vmatmul.mubr.bf16.gmra.mxu0 %v1296_v46  ;;  %556 = vmatmul.mubr.bf16.gmra.mxu1 %v1297_v47 }
  0xe2   :  { %v1122_v48 = vpop.f32.mrf.mxu0  ;;  %v1170_v49 = vpop.f32.mrf.mxu1 }
  0xe4   :  { %v1123_v50 = vpop.f32.mrf.mxu0  ;;  %v1171_v51 = vpop.f32.mrf.mxu1 }
  0xe5   :  { %v1124_v52 = vadd.f32 %v1123_v50, %v1122_v48  ;;  %v1172_v54 = vadd.f32 %v1171_v51, %v1170_v49 }
  0xe6   :  { %v1125_v55 = vpop.f32.mrf.mxu0  ;;  %v1173_v56 = vpop.f32.mrf.mxu1 }
  0xe7   :  { %v670_v57 = vadd.f32 %v1124_v52, %v1465_v53  ;;  %v686_v58 = vadd.f32 %v1172_v54, %v1465_v53 }
  0xe8   :  { %v1126_v59 = vpop.f32.mrf.mxu0  ;;  %v1174_v60 = vpop.f32.mrf.mxu1 }
  0xe9   :  { %v1127_v61 = vadd.f32 %v1126_v59, %v1125_v55  ;;  %v1175_v62 = vadd.f32 %v1174_v60, %v1173_v56  ;;  %v702_v3 = vmax.f32 %v670_v57, 0.0  ;;  %v718_v4 = vmax.f32 %v686_v58, 0.0 }
  0xea   :  { %v1128_v63 = vpop.f32.mrf.mxu0  ;;  %v1176_v0 = vpop.f32.mrf.mxu1 }
  0xeb   :  { %v671_v1 = vadd.f32 %v1127_v61, %v1465_v53  ;;  %v687_v2 = vadd.f32 %v1175_v62, %v1465_v53 }
  0xec   :  { %v1129_v5 = vpop.f32.mrf.mxu0  ;;  %v1177_v6 = vpop.f32.mrf.mxu1 }
  0xed   :  { %v703_v7 = vmax.f32 %v671_v1, 0.0  ;;  %v719_v8 = vmax.f32 %v687_v2, 0.0  ;;  %v1130_v9 = vadd.f32 %v1129_v5, %v1128_v63  ;;  %v1178_v10 = vadd.f32 %v1177_v6, %v1176_v0 }
  0xee   :  { %v1131_v11 = vpop.f32.mrf.mxu0  ;;  %v1179_v12 = vpop.f32.mrf.mxu1 }
  0xef   :  { %v1014_v13 = vpack.c.bf16 %v703_v7, %v702_v3  ;;  %v1054_v14 = vpack.c.bf16 %v719_v8, %v718_v4  ;;  %v672_v15 = vadd.f32 %v1130_v9, %v1465_v53  ;;  %v688_v16 = vadd.f32 %v1178_v10, %v1465_v53 }
  0xf0   :  { %v1132_v17 = vpop.f32.mrf.mxu0  ;;  %v1180_v18 = vpop.f32.mrf.mxu1 }
  0xf1   :  { %1015 = vst [vmem:[%s1550_s3] sm:$0xff] %v1014_v13   ;;  %1098 = vst [vmem:[%s1550_s3 + $0x40] sm:$0xff] %v1054_v14   ;;  %v1133_v19 = vadd.f32 %v1132_v17, %v1131_v11  ;;  %v1181_v20 = vadd.f32 %v1180_v18, %v1179_v12  ;;  %v704_v25 = vmax.f32 %v672_v15, 0.0  ;;  %v720_v26 = vmax.f32 %v688_v16, 0.0 }
  0xf2   :  { %v1134_v21 = vpop.f32.mrf.mxu0  ;;  %v1182_v22 = vpop.f32.mrf.mxu1 }
  0xf3   :  { %v673_v23 = vadd.f32 %v1133_v19, %v1465_v53  ;;  %v689_v24 = vadd.f32 %v1181_v20, %v1465_v53 }
  0xf4   :  { %v1135_v27 = vpop.f32.mrf.mxu0  ;;  %v1183_v28 = vpop.f32.mrf.mxu1 }
  0xf5   :  { %v705_v29 = vmax.f32 %v673_v23, 0.0  ;;  %v721_v30 = vmax.f32 %v689_v24, 0.0  ;;  %v1136_v31 = vadd.f32 %v1135_v27, %v1134_v21  ;;  %v1184_v32 = vadd.f32 %v1183_v28, %v1182_v22 }
  0xf6   :  { %v1137_v33 = vpop.f32.mrf.mxu0  ;;  %v1185_v34 = vpop.f32.mrf.mxu1 }
  0xf7   :  { %v1019_v35 = vpack.c.bf16 %v705_v29, %v704_v25  ;;  %v1059_v36 = vpack.c.bf16 %v721_v30, %v720_v26  ;;  %v674_v37 = vadd.f32 %v1136_v31, %v1465_v53  ;;  %v690_v38 = vadd.f32 %v1184_v32, %v1465_v53 }
  0xf8   :  { %v1138_v39 = vpop.f32.mrf.mxu0  ;;  %v1186_v40 = vpop.f32.mrf.mxu1 }
  0xf9   :  { %1091 = vst [vmem:[%s1550_s3 + $0x8] sm:$0xff] %v1019_v35   ;;  %1099 = vst [vmem:[%s1550_s3 + $0x48] sm:$0xff] %v1059_v36   ;;  %v1139_v41 = vadd.f32 %v1138_v39, %v1137_v33  ;;  %v1187_v42 = vadd.f32 %v1186_v40, %v1185_v34  ;;  %v706_v47 = vmax.f32 %v674_v37, 0.0  ;;  %v722_v48 = vmax.f32 %v690_v38, 0.0 }
  0xfa   :  { %v1140_v43 = vpop.f32.mrf.mxu0  ;;  %v1188_v44 = vpop.f32.mrf.mxu1 }
  0xfb   :  { %v675_v45 = vadd.f32 %v1139_v41, %v1465_v53  ;;  %v691_v46 = vadd.f32 %v1187_v42, %v1465_v53 }
  0xfc   :  { %v1141_v49 = vpop.f32.mrf.mxu0  ;;  %v1189_v50 = vpop.f32.mrf.mxu1 }
  0xfd   :  { %v707_v51 = vmax.f32 %v675_v45, 0.0  ;;  %v723_v52 = vmax.f32 %v691_v46, 0.0  ;;  %v1142_v54 = vadd.f32 %v1141_v49, %v1140_v43  ;;  %v1190_v55 = vadd.f32 %v1189_v50, %v1188_v44 }
  0xfe   :  { %v1143_v56 = vpop.f32.mrf.mxu0  ;;  %v1191_v57 = vpop.f32.mrf.mxu1 }
  0xff   :  { %v1024_v58 = vpack.c.bf16 %v707_v51, %v706_v47  ;;  %v1064_v59 = vpack.c.bf16 %v723_v52, %v722_v48  ;;  %v676_v60 = vadd.f32 %v1142_v54, %v1465_v53  ;;  %v692_v61 = vadd.f32 %v1190_v55, %v1465_v53 }
 0x100   :  { %v1144_v62 = vpop.f32.mrf.mxu0  ;;  %v1192_v63 = vpop.f32.mrf.mxu1 }
 0x101   :  { %1092 = vst [vmem:[%s1550_s3 + $0x10] sm:$0xff] %v1024_v58   ;;  %1100 = vst [vmem:[%s1550_s3 + $0x50] sm:$0xff] %v1064_v59   ;;  %v1145_v0 = vadd.f32 %v1144_v62, %v1143_v56  ;;  %v1193_v1 = vadd.f32 %v1192_v63, %v1191_v57  ;;  %v708_v6 = vmax.f32 %v676_v60, 0.0  ;;  %v724_v7 = vmax.f32 %v692_v61, 0.0 }
 0x102   :  { %v1146_v2 = vpop.f32.mrf.mxu0  ;;  %v1194_v3 = vpop.f32.mrf.mxu1 }
 0x103   :  { %v677_v4 = vadd.f32 %v1145_v0, %v1465_v53  ;;  %v693_v5 = vadd.f32 %v1193_v1, %v1465_v53 }
 0x104   :  { %v1147_v8 = vpop.f32.mrf.mxu0  ;;  %v1195_v9 = vpop.f32.mrf.mxu1 }
 0x105   :  { %v709_v10 = vmax.f32 %v677_v4, 0.0  ;;  %v725_v11 = vmax.f32 %v693_v5, 0.0  ;;  %v1148_v12 = vadd.f32 %v1147_v8, %v1146_v2  ;;  %v1196_v13 = vadd.f32 %v1195_v9, %v1194_v3 }
 0x106   :  { %v1149_v14 = vpop.f32.mrf.mxu0  ;;  %v1197_v15 = vpop.f32.mrf.mxu1 }
 0x107   :  { %v1029_v16 = vpack.c.bf16 %v709_v10, %v708_v6  ;;  %v1069_v17 = vpack.c.bf16 %v725_v11, %v724_v7  ;;  %v678_v18 = vadd.f32 %v1148_v12, %v1465_v53  ;;  %v694_v19 = vadd.f32 %v1196_v13, %v1465_v53 }
 0x108   :  { %v1150_v20 = vpop.f32.mrf.mxu0  ;;  %v1198_v21 = vpop.f32.mrf.mxu1 }
 0x109   :  { %1093 = vst [vmem:[%s1550_s3 + $0x18] sm:$0xff] %v1029_v16   ;;  %1101 = vst [vmem:[%s1550_s3 + $0x58] sm:$0xff] %v1069_v17   ;;  %v1151_v22 = vadd.f32 %v1150_v20, %v1149_v14  ;;  %v1199_v23 = vadd.f32 %v1198_v21, %v1197_v15  ;;  %v710_v28 = vmax.f32 %v678_v18, 0.0  ;;  %v726_v29 = vmax.f32 %v694_v19, 0.0 }
 0x10a   :  { %v1152_v24 = vpop.f32.mrf.mxu0  ;;  %v1200_v25 = vpop.f32.mrf.mxu1 }
 0x10b   :  { %v679_v26 = vadd.f32 %v1151_v22, %v1465_v53  ;;  %v695_v27 = vadd.f32 %v1199_v23, %v1465_v53 }
 0x10c   :  { %v1153_v30 = vpop.f32.mrf.mxu0  ;;  %v1201_v31 = vpop.f32.mrf.mxu1 }
 0x10d   :  { %v711_v32 = vmax.f32 %v679_v26, 0.0  ;;  %v727_v33 = vmax.f32 %v695_v27, 0.0  ;;  %v1154_v34 = vadd.f32 %v1153_v30, %v1152_v24  ;;  %v1202_v35 = vadd.f32 %v1201_v31, %v1200_v25 }
 0x10e   :  { %v1155_v36 = vpop.f32.mrf.mxu0  ;;  %v1203_v37 = vpop.f32.mrf.mxu1 }
 0x10f   :  { %v1034_v38 = vpack.c.bf16 %v711_v32, %v710_v28  ;;  %v1074_v39 = vpack.c.bf16 %v727_v33, %v726_v29  ;;  %v680_v40 = vadd.f32 %v1154_v34, %v1465_v53  ;;  %v696_v41 = vadd.f32 %v1202_v35, %v1465_v53 }
 0x110   :  { %v1156_v42 = vpop.f32.mrf.mxu0  ;;  %v1204_v43 = vpop.f32.mrf.mxu1 }
 0x111   :  { %1094 = vst [vmem:[%s1550_s3 + $0x20] sm:$0xff] %v1034_v38   ;;  %1102 = vst [vmem:[%s1550_s3 + $0x60] sm:$0xff] %v1074_v39   ;;  %v1157_v44 = vadd.f32 %v1156_v42, %v1155_v36  ;;  %v1205_v45 = vadd.f32 %v1204_v43, %v1203_v37  ;;  %v712_v50 = vmax.f32 %v680_v40, 0.0  ;;  %v728_v51 = vmax.f32 %v696_v41, 0.0 }
 0x112   :  { %v1158_v46 = vpop.f32.mrf.mxu0  ;;  %v1206_v47 = vpop.f32.mrf.mxu1 }
 0x113   :  { %v681_v48 = vadd.f32 %v1157_v44, %v1465_v53  ;;  %v697_v49 = vadd.f32 %v1205_v45, %v1465_v53 }
 0x114   :  { %v1159_v52 = vpop.f32.mrf.mxu0  ;;  %v1207_v54 = vpop.f32.mrf.mxu1 }
 0x115   :  { %v713_v55 = vmax.f32 %v681_v48, 0.0  ;;  %v729_v56 = vmax.f32 %v697_v49, 0.0  ;;  %v1160_v57 = vadd.f32 %v1159_v52, %v1158_v46  ;;  %v1208_v58 = vadd.f32 %v1207_v54, %v1206_v47 }
 0x116   :  { %v1161_v59 = vpop.f32.mrf.mxu0  ;;  %v1209_v60 = vpop.f32.mrf.mxu1 }
 0x117   :  { %v1039_v61 = vpack.c.bf16 %v713_v55, %v712_v50  ;;  %v1079_v62 = vpack.c.bf16 %v729_v56, %v728_v51  ;;  %v682_v63 = vadd.f32 %v1160_v57, %v1465_v53  ;;  %v698_v0 = vadd.f32 %v1208_v58, %v1465_v53 }
 0x118   :  { %v1162_v1 = vpop.f32.mrf.mxu0  ;;  %v1210_v2 = vpop.f32.mrf.mxu1 }
 0x119   :  { %1095 = vst [vmem:[%s1550_s3 + $0x28] sm:$0xff] %v1039_v61   ;;  %1103 = vst [vmem:[%s1550_s3 + $0x68] sm:$0xff] %v1079_v62   ;;  %v1163_v3 = vadd.f32 %v1162_v1, %v1161_v59  ;;  %v1211_v4 = vadd.f32 %v1210_v2, %v1209_v60  ;;  %v714_v9 = vmax.f32 %v682_v63, 0.0  ;;  %v730_v10 = vmax.f32 %v698_v0, 0.0 }
 0x11a   :  { %v1164_v5 = vpop.f32.mrf.mxu0  ;;  %v1212_v6 = vpop.f32.mrf.mxu1 }
 0x11b   :  { %v683_v7 = vadd.f32 %v1163_v3, %v1465_v53  ;;  %v699_v8 = vadd.f32 %v1211_v4, %v1465_v53 }
 0x11c   :  { %v1165_v11 = vpop.f32.mrf.mxu0  ;;  %v1213_v12 = vpop.f32.mrf.mxu1 }
 0x11d   :  { %v715_v13 = vmax.f32 %v683_v7, 0.0  ;;  %v731_v14 = vmax.f32 %v699_v8, 0.0  ;;  %v1166_v15 = vadd.f32 %v1165_v11, %v1164_v5  ;;  %v1214_v16 = vadd.f32 %v1213_v12, %v1212_v6 }
 0x11e   :  { %v1167_v17 = vpop.f32.mrf.mxu0  ;;  %v1215_v18 = vpop.f32.mrf.mxu1 }
 0x11f   :  { %v1044_v19 = vpack.c.bf16 %v715_v13, %v714_v9  ;;  %v1084_v20 = vpack.c.bf16 %v731_v14, %v730_v10  ;;  %v684_v23 = vadd.f32 %v1166_v15, %v1465_v53  ;;  %v700_v24 = vadd.f32 %v1214_v16, %v1465_v53 }
 0x120   :  { %v1168_v21 = vpop.f32.mrf.mxu0  ;;  %v1216_v22 = vpop.f32.mrf.mxu1 }
 0x121   :  { %1096 = vst [vmem:[%s1550_s3 + $0x30] sm:$0xff] %v1044_v19   ;;  %1104 = vst [vmem:[%s1550_s3 + $0x70] sm:$0xff] %v1084_v20   ;;  %v1169_v25 = vadd.f32 %v1168_v21, %v1167_v17  ;;  %v1217_v26 = vadd.f32 %v1216_v22, %v1215_v18  ;;  %v716_v29 = vmax.f32 %v684_v23, 0.0  ;;  %v732_v30 = vmax.f32 %v700_v24, 0.0 }
 0x123   :  { %v685_v27 = vadd.f32 %v1169_v25, %v1465_v53  ;;  %v701_v28 = vadd.f32 %v1217_v26, %v1465_v53 }
 0x125   :  { %v717_v31 = vmax.f32 %v685_v27, 0.0  ;;  %v733_v32 = vmax.f32 %v701_v28, 0.0 }
 0x127   :  { %v1049_v33 = vpack.c.bf16 %v717_v31, %v716_v29  ;;  %v1089_v34 = vpack.c.bf16 %v733_v32, %v732_v30 }
 0x129   :  { %1097 = vst [vmem:[%s1550_s3 + $0x38] sm:$0xff] %v1049_v33   ;;  %1105 = vst [vmem:[%s1550_s3 + $0x78] sm:$0xff] %v1089_v34  }

// kernel: gcn_forward.7
= control target key start
LH: loop header
LB: loop body
LE: loop exit
PB: predicated region body
PF: predicated region fallthrough
CT: control target
= control target key end

     0   :  { %s1276_s1 = inlined_call_operand.vmem [shape: bf16[256,128], index: 1, kind: input, shape index: {}]   ;;  %s1277_s0 = inlined_call_operand.vmem [shape: bf16[256,256], index: 0, kind: input, shape index: {}]   ;;  %s1278_s2 = inlined_call_operand.vmem [shape: f32[1,128], index: 2, kind: input, shape index: {}]   ;;  %s1279_s3 = inlined_call_operand.vmem [shape: f32[256,128], index: 3, kind: output, shape index: {}]  }
   0x1   :  { %v915_v0 = vld [vmem:[%s1276_s1 + $0x78] sm:$0xff]   ;;  %v917_v2 = vld [vmem:[%s1276_s1 + $0x70] sm:$0xff]   ;;  %v919_v4 = vld [vmem:[%s1276_s1 + $0x68] sm:$0xff]  }
   0x2   :  { %v916_v1 = vld [vmem:[%s1276_s1 + $0x38] sm:$0xff]   ;;  %787 = vmatprep.subr.bf16.mxu0 %v915_v0  ;;  %899 = vmatprep.subr.bf16.mxu1 %v915_v0  ;;  %v918_v3 = vld [vmem:[%s1276_s1 + $0x30] sm:$0xff]   ;;  %v920_v5 = vld [vmem:[%s1276_s1 + $0x28] sm:$0xff]  }
   0x3   :  { %788 = vmatpush3.bf16.msra.mxu0 %v916_v1  ;;  %907 = vmatpush3.bf16.msra.mxu1 %v916_v1  ;;  %v921_v6 = vld [vmem:[%s1276_s1 + $0x60] sm:$0xff]   ;;  %v923_v8 = vld [vmem:[%s1276_s1 + $0x58] sm:$0xff]   ;;  %v925_v10 = vld [vmem:[%s1276_s1 + $0x50] sm:$0xff]  }
   0x4   :  { %789 = vmatprep.subr.bf16.mxu0 %v917_v2  ;;  %900 = vmatprep.subr.bf16.mxu1 %v917_v2  ;;  %v922_v7 = vld [vmem:[%s1276_s1 + $0x20] sm:$0xff]   ;;  %v924_v9 = vld [vmem:[%s1276_s1 + $0x18] sm:$0xff]   ;;  %v926_v13 = vld [vmem:[%s1276_s1 + $0x10] sm:$0xff]  }
   0x5   :  { %v933_v11 = vld [vmem:[%s1277_s0 + $0x4] ss:$8 sps:$4 sm:$0xff]   ;;  %v931_v18 = vld [vmem:[%s1277_s0] ss:$8 sps:$4 sm:$0xff]   ;;  %v937_v20 = vld [vmem:[%s1277_s0 + $0x14] ss:$8 sps:$4 sm:$0xff]  }
   0x6   :  { %v936_v12 = vld [vmem:[%s1277_s0 + $0x84] ss:$8 sps:$4 sm:$0xff]   ;;  %435 = vmatprep.mubr.bf16.mxu0 %v933_v11  ;;  %v934_v19 = vld [vmem:[%s1277_s0 + $0x80] ss:$8 sps:$4 sm:$0xff]   ;;  %v939_v21 = vld [vmem:[%s1277_s0 + $0x94] ss:$8 sps:$4 sm:$0xff]  }
   0x7   :  { %790 = vmatpush3.bf16.msra.mxu0 %v918_v3  ;;  %908 = vmatpush3.bf16.msra.mxu1 %v918_v3  ;;  %v927_v14 = vld [vmem:[%s1276_s1 + $0x48] sm:$0xff]   ;;  %v929_v16 = vld [vmem:[%s1276_s1 + $0x40] sm:$0xff]   ;;  %v941_v22 = vld [vmem:[%s1277_s0 + $0x10] ss:$8 sps:$4 sm:$0xff]  }
   0x8   :  { %791 = vmatprep.subr.bf16.mxu0 %v919_v4  ;;  %901 = vmatprep.subr.bf16.mxu1 %v919_v4  ;;  %v928_v15 = vld [vmem:[%s1276_s1 + $0x8] sm:$0xff]   ;;  %v930_v17 = vld [vmem:[%s1276_s1] sm:$0xff]   ;;  %v942_v23 = vld [vmem:[%s1277_s0 + $0x90] ss:$8 sps:$4 sm:$0xff]  }
   0x9   :  { %499 = vmatprep.mubr.bf16.mxu1 %v936_v12  ;;  %v943_v24 = vld [vmem:[%s1277_s0 + $0x24] ss:$8 sps:$4 sm:$0xff]   ;;  %v947_v26 = vld [vmem:[%s1277_s0 + $0x20] ss:$8 sps:$4 sm:$0xff]   ;;  %v949_v28 = vld [vmem:[%s1277_s0 + $0x34] ss:$8 sps:$4 sm:$0xff]  }
   0xa   :  { %v945_v25 = vld [vmem:[%s1277_s0 + $0xa4] ss:$8 sps:$4 sm:$0xff]   ;;  %v948_v27 = vld [vmem:[%s1277_s0 + $0xa0] ss:$8 sps:$4 sm:$0xff]   ;;  %v951_v29 = vld [vmem:[%s1277_s0 + $0xb4] ss:$8 sps:$4 sm:$0xff]  }
   0xb   :  { %792 = vmatpush3.bf16.msra.mxu0 %v920_v5  ;;  %909 = vmatpush3.bf16.msra.mxu1 %v920_v5  ;;  %v953_v30 = vld [vmem:[%s1277_s0 + $0x30] ss:$8 sps:$4 sm:$0xff]   ;;  %v955_v32 = vld [vmem:[%s1277_s0 + $0x44] ss:$8 sps:$4 sm:$0xff]   ;;  %v959_v34 = vld [vmem:[%s1277_s0 + $0x40] ss:$8 sps:$4 sm:$0xff]  }
   0xc   :  { %793 = vmatprep.subr.bf16.mxu0 %v921_v6  ;;  %902 = vmatprep.subr.bf16.mxu1 %v921_v6  ;;  %v954_v31 = vld [vmem:[%s1277_s0 + $0xb0] ss:$8 sps:$4 sm:$0xff]   ;;  %v957_v33 = vld [vmem:[%s1277_s0 + $0xc4] ss:$8 sps:$4 sm:$0xff]   ;;  %v960_v35 = vld [vmem:[%s1277_s0 + $0xc0] ss:$8 sps:$4 sm:$0xff]  }
   0xd   :  { %v961_v36 = vld [vmem:[%s1277_s0 + $0x54] ss:$8 sps:$4 sm:$0xff]   ;;  %v965_v38 = vld [vmem:[%s1277_s0 + $0x50] ss:$8 sps:$4 sm:$0xff]   ;;  %v967_v40 = vld [vmem:[%s1277_s0 + $0x64] ss:$8 sps:$4 sm:$0xff]  }
   0xe   :  { %v963_v37 = vld [vmem:[%s1277_s0 + $0xd4] ss:$8 sps:$4 sm:$0xff]   ;;  %v966_v39 = vld [vmem:[%s1277_s0 + $0xd0] ss:$8 sps:$4 sm:$0xff]   ;;  %v969_v41 = vld [vmem:[%s1277_s0 + $0xe4] ss:$8 sps:$4 sm:$0xff]  }
   0xf   :  { %794 = vmatpush3.bf16.msra.mxu0 %v922_v7  ;;  %910 = vmatpush3.bf16.msra.mxu1 %v922_v7  ;;  %v971_v42 = vld [vmem:[%s1277_s0 + $0x60] ss:$8 sps:$4 sm:$0xff]   ;;  %v973_v44 = vld [vmem:[%s1277_s0 + $0x74] ss:$8 sps:$4 sm:$0xff]   ;;  %v977_v46 = vld [vmem:[%s1277_s0 + $0x70] ss:$8 sps:$4 sm:$0xff]  }
  0x10   :  { %795 = vmatprep.subr.bf16.mxu0 %v923_v8  ;;  %903 = vmatprep.subr.bf16.mxu1 %v923_v8  ;;  %v972_v43 = vld [vmem:[%s1277_s0 + $0xe0] ss:$8 sps:$4 sm:$0xff]   ;;  %v975_v45 = vld [vmem:[%s1277_s0 + $0xf4] ss:$8 sps:$4 sm:$0xff]   ;;  %v978_v47 = vld [vmem:[%s1277_s0 + $0xf0] ss:$8 sps:$4 sm:$0xff]  }
  0x11   :  { %v1146_v51 = vld [vmem:[%s1278_s2] ss:$0 sm:$0xff] }
  0x13   :  { %796 = vmatpush3.bf16.msra.mxu0 %v924_v9  ;;  %911 = vmatpush3.bf16.msra.mxu1 %v924_v9 }
  0x14   :  { %797 = vmatprep.subr.bf16.mxu0 %v925_v10  ;;  %904 = vmatprep.subr.bf16.mxu1 %v925_v10 }
  0x17   :  { %798 = vmatpush3.bf16.msra.mxu0 %v926_v13  ;;  %912 = vmatpush3.bf16.msra.mxu1 %v926_v13 }
  0x18   :  { %799 = vmatprep.subr.bf16.mxu0 %v927_v14  ;;  %905 = vmatprep.subr.bf16.mxu1 %v927_v14 }
  0x1b   :  { %800 = vmatpush3.bf16.msra.mxu0 %v928_v15  ;;  %913 = vmatpush3.bf16.msra.mxu1 %v928_v15 }
  0x1c   :  { %801 = vmatprep.subr.bf16.mxu0 %v929_v16  ;;  %906 = vmatprep.subr.bf16.mxu1 %v929_v16 }
  0x1f   :  { %802 = vmatpush3.bf16.msra.mxu0 %v930_v17  ;;  %914 = vmatpush3.bf16.msra.mxu1 %v930_v17 }
  0x22   :  { %436 = vmatmul.mubr.bf16.vlgmr.msra.gmra.mxu0 %v931_v18  ;;  %500 = vmatmul.mubr.bf16.vlgmr.msra.gmra.mxu1 %v934_v19 }
  0x23   :  { %443 = vmatprep.mubr.bf16.mxu0 %v937_v20  ;;  %507 = vmatprep.mubr.bf16.mxu1 %v939_v21 }
  0x2a   :  { %444 = vmatmul.mubr.bf16.gmra.mxu0 %v941_v22  ;;  %508 = vmatmul.mubr.bf16.gmra.mxu1 %v942_v23 }
  0x2b   :  { %451 = vmatprep.mubr.bf16.mxu0 %v943_v24  ;;  %515 = vmatprep.mubr.bf16.mxu1 %v945_v25 }
  0x32   :  { %452 = vmatmul.mubr.bf16.gmra.mxu0 %v947_v26  ;;  %516 = vmatmul.mubr.bf16.gmra.mxu1 %v948_v27 }
  0x33   :  { %459 = vmatprep.mubr.bf16.mxu0 %v949_v28  ;;  %523 = vmatprep.mubr.bf16.mxu1 %v951_v29 }
  0x3a   :  { %460 = vmatmul.mubr.bf16.gmra.mxu0 %v953_v30  ;;  %524 = vmatmul.mubr.bf16.gmra.mxu1 %v954_v31 }
  0x3b   :  { %467 = vmatprep.mubr.bf16.mxu0 %v955_v32  ;;  %531 = vmatprep.mubr.bf16.mxu1 %v957_v33 }
  0x42   :  { %468 = vmatmul.mubr.bf16.gmra.mxu0 %v959_v34  ;;  %532 = vmatmul.mubr.bf16.gmra.mxu1 %v960_v35 }
  0x43   :  { %475 = vmatprep.mubr.bf16.mxu0 %v961_v36  ;;  %539 = vmatprep.mubr.bf16.mxu1 %v963_v37 }
  0x4a   :  { %476 = vmatmul.mubr.bf16.gmra.mxu0 %v965_v38  ;;  %540 = vmatmul.mubr.bf16.gmra.mxu1 %v966_v39 }
  0x4b   :  { %483 = vmatprep.mubr.bf16.mxu0 %v967_v40  ;;  %547 = vmatprep.mubr.bf16.mxu1 %v969_v41 }
  0x52   :  { %484 = vmatmul.mubr.bf16.gmra.mxu0 %v971_v42  ;;  %548 = vmatmul.mubr.bf16.gmra.mxu1 %v972_v43 }
  0x53   :  { %491 = vmatprep.mubr.bf16.mxu0 %v973_v44  ;;  %555 = vmatprep.mubr.bf16.mxu1 %v975_v45 }
  0x5a   :  { %492 = vmatmul.mubr.bf16.gmra.mxu0 %v977_v46  ;;  %556 = vmatmul.mubr.bf16.gmra.mxu1 %v978_v47 }
  0xe2   :  { %v803_v48 = vpop.f32.mrf.mxu0  ;;  %v851_v49 = vpop.f32.mrf.mxu1 }
  0xe4   :  { %v804_v50 = vpop.f32.mrf.mxu0  ;;  %v852_v52 = vpop.f32.mrf.mxu1 }
  0xe5   :  { %v805_v53 = vadd.f32 %v804_v50, %v803_v48  ;;  %v853_v54 = vadd.f32 %v852_v52, %v851_v49 }
  0xe6   :  { %v806_v55 = vpop.f32.mrf.mxu0  ;;  %v854_v56 = vpop.f32.mrf.mxu1 }
  0xe7   :  { %v670_v57 = vadd.f32 %v805_v53, %v1146_v51  ;;  %v686_v58 = vadd.f32 %v853_v54, %v1146_v51 }
  0xe8   :  { %v807_v59 = vpop.f32.mrf.mxu0  ;;  %v855_v60 = vpop.f32.mrf.mxu1 }
  0xe9   :  { %702 = vst [vmem:[%s1279_s3] sm:$0xff] %v670_v57  ;;  %718 = vst [vmem:[%s1279_s3 + $0x80] sm:$0xff] %v686_v58  ;;  %v808_v61 = vadd.f32 %v807_v59, %v806_v55  ;;  %v856_v62 = vadd.f32 %v855_v60, %v854_v56 }
  0xea   :  { %v809_v63 = vpop.f32.mrf.mxu0  ;;  %v857_v0 = vpop.f32.mrf.mxu1 }
  0xeb   :  { %v671_v1 = vadd.f32 %v808_v61, %v1146_v51  ;;  %v687_v2 = vadd.f32 %v856_v62, %v1146_v51 }
  0xec   :  { %v810_v3 = vpop.f32.mrf.mxu0  ;;  %v858_v4 = vpop.f32.mrf.mxu1 }
  0xed   :  { %703 = vst [vmem:[%s1279_s3 + $0x8] sm:$0xff] %v671_v1  ;;  %719 = vst [vmem:[%s1279_s3 + $0x88] sm:$0xff] %v687_v2  ;;  %v811_v5 = vadd.f32 %v810_v3, %v809_v63  ;;  %v859_v6 = vadd.f32 %v858_v4, %v857_v0 }
  0xee   :  { %v812_v7 = vpop.f32.mrf.mxu0  ;;  %v860_v8 = vpop.f32.mrf.mxu1 }
  0xef   :  { %v672_v9 = vadd.f32 %v811_v5, %v1146_v51  ;;  %v688_v10 = vadd.f32 %v859_v6, %v1146_v51 }
  0xf0   :  { %v813_v11 = vpop.f32.mrf.mxu0  ;;  %v861_v12 = vpop.f32.mrf.mxu1 }
  0xf1   :  { %704 = vst [vmem:[%s1279_s3 + $0x10] sm:$0xff] %v672_v9  ;;  %720 = vst [vmem:[%s1279_s3 + $0x90] sm:$0xff] %v688_v10  ;;  %v814_v13 = vadd.f32 %v813_v11, %v812_v7  ;;  %v862_v14 = vadd.f32 %v861_v12, %v860_v8 }
  0xf2   :  { %v815_v15 = vpop.f32.mrf.mxu0  ;;  %v863_v16 = vpop.f32.mrf.mxu1 }
  0xf3   :  { %v673_v17 = vadd.f32 %v814_v13, %v1146_v51  ;;  %v689_v18 = vadd.f32 %v862_v14, %v1146_v51 }
  0xf4   :  { %v816_v19 = vpop.f32.mrf.mxu0  ;;  %v864_v20 = vpop.f32.mrf.mxu1 }
  0xf5   :  { %705 = vst [vmem:[%s1279_s3 + $0x18] sm:$0xff] %v673_v17  ;;  %721 = vst [vmem:[%s1279_s3 + $0x98] sm:$0xff] %v689_v18  ;;  %v817_v21 = vadd.f32 %v816_v19, %v815_v15  ;;  %v865_v22 = vadd.f32 %v864_v20, %v863_v16 }
  0xf6   :  { %v818_v23 = vpop.f32.mrf.mxu0  ;;  %v866_v24 = vpop.f32.mrf.mxu1 }
  0xf7   :  { %v674_v25 = vadd.f32 %v817_v21, %v1146_v51  ;;  %v690_v26 = vadd.f32 %v865_v22, %v1146_v51 }
  0xf8   :  { %v819_v27 = vpop.f32.mrf.mxu0  ;;  %v867_v28 = vpop.f32.mrf.mxu1 }
  0xf9   :  { %706 = vst [vmem:[%s1279_s3 + $0x20] sm:$0xff] %v674_v25  ;;  %722 = vst [vmem:[%s1279_s3 + $0xa0] sm:$0xff] %v690_v26  ;;  %v820_v29 = vadd.f32 %v819_v27, %v818_v23  ;;  %v868_v30 = vadd.f32 %v867_v28, %v866_v24 }
  0xfa   :  { %v821_v31 = vpop.f32.mrf.mxu0  ;;  %v869_v32 = vpop.f32.mrf.mxu1 }
  0xfb   :  { %v675_v33 = vadd.f32 %v820_v29, %v1146_v51  ;;  %v691_v34 = vadd.f32 %v868_v30, %v1146_v51 }
  0xfc   :  { %v822_v35 = vpop.f32.mrf.mxu0  ;;  %v870_v36 = vpop.f32.mrf.mxu1 }
  0xfd   :  { %707 = vst [vmem:[%s1279_s3 + $0x28] sm:$0xff] %v675_v33  ;;  %723 = vst [vmem:[%s1279_s3 + $0xa8] sm:$0xff] %v691_v34  ;;  %v823_v37 = vadd.f32 %v822_v35, %v821_v31  ;;  %v871_v38 = vadd.f32 %v870_v36, %v869_v32 }
  0xfe   :  { %v824_v39 = vpop.f32.mrf.mxu0  ;;  %v872_v40 = vpop.f32.mrf.mxu1 }
  0xff   :  { %v676_v41 = vadd.f32 %v823_v37, %v1146_v51  ;;  %v692_v42 = vadd.f32 %v871_v38, %v1146_v51 }
 0x100   :  { %v825_v43 = vpop.f32.mrf.mxu0  ;;  %v873_v44 = vpop.f32.mrf.mxu1 }
 0x101   :  { %708 = vst [vmem:[%s1279_s3 + $0x30] sm:$0xff] %v676_v41  ;;  %724 = vst [vmem:[%s1279_s3 + $0xb0] sm:$0xff] %v692_v42  ;;  %v826_v45 = vadd.f32 %v825_v43, %v824_v39  ;;  %v874_v46 = vadd.f32 %v873_v44, %v872_v40 }
 0x102   :  { %v827_v47 = vpop.f32.mrf.mxu0  ;;  %v875_v48 = vpop.f32.mrf.mxu1 }
 0x103   :  { %v677_v49 = vadd.f32 %v826_v45, %v1146_v51  ;;  %v693_v50 = vadd.f32 %v874_v46, %v1146_v51 }
 0x104   :  { %v828_v52 = vpop.f32.mrf.mxu0  ;;  %v876_v53 = vpop.f32.mrf.mxu1 }
 0x105   :  { %709 = vst [vmem:[%s1279_s3 + $0x38] sm:$0xff] %v677_v49  ;;  %725 = vst [vmem:[%s1279_s3 + $0xb8] sm:$0xff] %v693_v50  ;;  %v829_v54 = vadd.f32 %v828_v52, %v827_v47  ;;  %v877_v55 = vadd.f32 %v876_v53, %v875_v48 }
 0x106   :  { %v830_v56 = vpop.f32.mrf.mxu0  ;;  %v878_v57 = vpop.f32.mrf.mxu1 }
 0x107   :  { %v678_v58 = vadd.f32 %v829_v54, %v1146_v51  ;;  %v694_v59 = vadd.f32 %v877_v55, %v1146_v51 }
 0x108   :  { %v831_v60 = vpop.f32.mrf.mxu0  ;;  %v879_v61 = vpop.f32.mrf.mxu1 }
 0x109   :  { %710 = vst [vmem:[%s1279_s3 + $0x40] sm:$0xff] %v678_v58  ;;  %726 = vst [vmem:[%s1279_s3 + $0xc0] sm:$0xff] %v694_v59  ;;  %v832_v62 = vadd.f32 %v831_v60, %v830_v56  ;;  %v880_v63 = vadd.f32 %v879_v61, %v878_v57 }
 0x10a   :  { %v833_v0 = vpop.f32.mrf.mxu0  ;;  %v881_v1 = vpop.f32.mrf.mxu1 }
 0x10b   :  { %v679_v2 = vadd.f32 %v832_v62, %v1146_v51  ;;  %v695_v3 = vadd.f32 %v880_v63, %v1146_v51 }
 0x10c   :  { %v834_v4 = vpop.f32.mrf.mxu0  ;;  %v882_v5 = vpop.f32.mrf.mxu1 }
 0x10d   :  { %711 = vst [vmem:[%s1279_s3 + $0x48] sm:$0xff] %v679_v2  ;;  %727 = vst [vmem:[%s1279_s3 + $0xc8] sm:$0xff] %v695_v3  ;;  %v835_v6 = vadd.f32 %v834_v4, %v833_v0  ;;  %v883_v7 = vadd.f32 %v882_v5, %v881_v1 }
 0x10e   :  { %v836_v8 = vpop.f32.mrf.mxu0  ;;  %v884_v9 = vpop.f32.mrf.mxu1 }
 0x10f   :  { %v680_v10 = vadd.f32 %v835_v6, %v1146_v51  ;;  %v696_v11 = vadd.f32 %v883_v7, %v1146_v51 }
 0x110   :  { %v837_v12 = vpop.f32.mrf.mxu0  ;;  %v885_v13 = vpop.f32.mrf.mxu1 }
 0x111   :  { %712 = vst [vmem:[%s1279_s3 + $0x50] sm:$0xff] %v680_v10  ;;  %728 = vst [vmem:[%s1279_s3 + $0xd0] sm:$0xff] %v696_v11  ;;  %v838_v14 = vadd.f32 %v837_v12, %v836_v8  ;;  %v886_v15 = vadd.f32 %v885_v13, %v884_v9 }
 0x112   :  { %v839_v16 = vpop.f32.mrf.mxu0  ;;  %v887_v17 = vpop.f32.mrf.mxu1 }
 0x113   :  { %v681_v18 = vadd.f32 %v838_v14, %v1146_v51  ;;  %v697_v19 = vadd.f32 %v886_v15, %v1146_v51 }
 0x114   :  { %v840_v20 = vpop.f32.mrf.mxu0  ;;  %v888_v21 = vpop.f32.mrf.mxu1 }
 0x115   :  { %713 = vst [vmem:[%s1279_s3 + $0x58] sm:$0xff] %v681_v18  ;;  %729 = vst [vmem:[%s1279_s3 + $0xd8] sm:$0xff] %v697_v19  ;;  %v841_v22 = vadd.f32 %v840_v20, %v839_v16  ;;  %v889_v23 = vadd.f32 %v888_v21, %v887_v17 }
 0x116   :  { %v842_v24 = vpop.f32.mrf.mxu0  ;;  %v890_v25 = vpop.f32.mrf.mxu1 }
 0x117   :  { %v682_v26 = vadd.f32 %v841_v22, %v1146_v51  ;;  %v698_v27 = vadd.f32 %v889_v23, %v1146_v51 }
 0x118   :  { %v843_v28 = vpop.f32.mrf.mxu0  ;;  %v891_v29 = vpop.f32.mrf.mxu1 }
 0x119   :  { %714 = vst [vmem:[%s1279_s3 + $0x60] sm:$0xff] %v682_v26  ;;  %730 = vst [vmem:[%s1279_s3 + $0xe0] sm:$0xff] %v698_v27  ;;  %v844_v30 = vadd.f32 %v843_v28, %v842_v24  ;;  %v892_v31 = vadd.f32 %v891_v29, %v890_v25 }
 0x11a   :  { %v845_v32 = vpop.f32.mrf.mxu0  ;;  %v893_v33 = vpop.f32.mrf.mxu1 }
 0x11b   :  { %v683_v34 = vadd.f32 %v844_v30, %v1146_v51  ;;  %v699_v35 = vadd.f32 %v892_v31, %v1146_v51 }
 0x11c   :  { %v846_v36 = vpop.f32.mrf.mxu0  ;;  %v894_v37 = vpop.f32.mrf.mxu1 }
 0x11d   :  { %715 = vst [vmem:[%s1279_s3 + $0x68] sm:$0xff] %v683_v34  ;;  %731 = vst [vmem:[%s1279_s3 + $0xe8] sm:$0xff] %v699_v35  ;;  %v847_v38 = vadd.f32 %v846_v36, %v845_v32  ;;  %v895_v39 = vadd.f32 %v894_v37, %v893_v33 }
 0x11e   :  { %v848_v40 = vpop.f32.mrf.mxu0  ;;  %v896_v41 = vpop.f32.mrf.mxu1 }
 0x11f   :  { %v684_v42 = vadd.f32 %v847_v38, %v1146_v51  ;;  %v700_v43 = vadd.f32 %v895_v39, %v1146_v51 }
 0x120   :  { %v849_v44 = vpop.f32.mrf.mxu0  ;;  %v897_v45 = vpop.f32.mrf.mxu1 }
 0x121   :  { %716 = vst [vmem:[%s1279_s3 + $0x70] sm:$0xff] %v684_v42  ;;  %732 = vst [vmem:[%s1279_s3 + $0xf0] sm:$0xff] %v700_v43  ;;  %v850_v46 = vadd.f32 %v849_v44, %v848_v40  ;;  %v898_v47 = vadd.f32 %v897_v45, %v896_v41 }
 0x123   :  { %v685_v48 = vadd.f32 %v850_v46, %v1146_v51  ;;  %v701_v49 = vadd.f32 %v898_v47, %v1146_v51 }
 0x125   :  { %717 = vst [vmem:[%s1279_s3 + $0x78] sm:$0xff] %v685_v48  ;;  %733 = vst [vmem:[%s1279_s3 + $0xf8] sm:$0xff] %v701_v49 }

</bundles_post_ra>
